<compile_context>
chip_gen: v5e
topology: v5e:2x2
jax: 0.10.0
libtpu: 0.0.40
codegen_flags: <defaults>
</compile_context>

<pallas_src>
import functools

import jax
import jax.numpy as jnp
from jax.experimental import pallas as pl
from jax.experimental.pallas import tpu as pltpu


def autoencoder_kernel(topk, unroll, embed_ref, enc_bias_ref, w_enc_t_ref,
                       w_dec_ref, dec_bias_ref, recon_ref, count_ref):
    TB, E = embed_ref.shape
    NF = w_enc_t_ref.shape[1]
    neg_inf = jnp.float32(-jnp.inf)
    big = jnp.float32(3.0e38)

    # ---- Encoder: project = (embed - bias) @ W_enc^T (bf16 MXU, f32 acc) ----
    x0 = embed_ref[...].astype(jnp.float32) - enc_bias_ref[...]    # (TB, E)
    project = jnp.dot(x0.astype(jnp.bfloat16), w_enc_t_ref[...],
                      preferred_element_type=jnp.float32)          # (TB, NF)
    # Clamp +-inf (e.g. bf16 matmul overflow) so the -inf sentinel used by the
    # top-k loop below is unambiguous.  NaN-free projections still assumed.
    project = jnp.clip(project, -big, big)

    # ---- Iterative top-k: knock out the row max `topk` times -----------------
    col = jax.lax.broadcasted_iota(jnp.int32, (1, NF), 1)          # sublane-bcast

    def select_one(_, p):
        mval = jnp.max(p, axis=-1, keepdims=True)                  # XLU row max
        sel = jnp.min(jnp.where(p == mval, col, NF),
                      axis=-1, keepdims=True)                      # first-index tie-break
        return jnp.where(col == sel, neg_inf, p)

    p = jax.lax.fori_loop(0, topk, select_one, project, unroll=unroll)

    # Selected positions are exactly the -inf sentinels left in `p`.
    selected = p == neg_inf                                        # (TB, NF) bool
    count_ref[0] = jnp.sum(selected.astype(jnp.int32), axis=0, keepdims=True)

    # ---- Decoder: sparse_project @ W_dec + bias (bf16 MXU, f32 acc) ----------
    sparse = jnp.where(selected, project, 0.0).astype(jnp.bfloat16)
    base = jnp.dot(sparse, w_dec_ref[...],
                   preferred_element_type=jnp.float32)             # (TB, E)
    base = base + dec_bias_ref[...]

    # ---- F.normalize(p=2, dim=-1, eps=1e-12) ----------------------------------
    ssq = jnp.maximum(jnp.sum(base * base, axis=-1, keepdims=True),
                      jnp.float32(1e-24))                          # (TB, 1)
    recon_ref[...] = (base * jax.lax.rsqrt(ssq)).astype(recon_ref.dtype)


def prepare_params(params):
    """One-time layout/dtype prep (do at init/load time, NOT per forward):
    encoder weight stored pre-transposed as (E, NF) bf16, decoder as (NF, E)
    bf16, biases as (1, E) f32."""
    E = params["enc_bias"].shape[0]
    return {
        "w_enc_t": jnp.asarray(params["w_enc"], jnp.float32).T.astype(jnp.bfloat16),
        "w_dec": jnp.asarray(params["w_dec"], jnp.float32).astype(jnp.bfloat16),
        "enc_bias": jnp.asarray(params["enc_bias"], jnp.float32).reshape(1, E),
        "dec_bias": jnp.asarray(params["dec_bias"], jnp.float32).reshape(1, E),
    }


def _tpu_generation_and_vmem():
    """(preferred batch tile rows, per-core VMEM capacity in bytes)."""
    kind = ""
    try:
        kind = jax.devices()[0].device_kind.lower()
    except Exception:
        pass
    try:
        vmem_cap = int(pltpu.get_tpu_info().vmem_capacity_bytes)
    except Exception:
        vmem_cap = (64 << 20) if "v7" in kind else (128 << 20)
    prefer_tb = 128 if "v5" in kind else 256    # v5e MXU is 128-wide; v6e/v7x 256
    return prefer_tb, vmem_cap


def _pick_batch_block(B, E, NF, embed_bytes, recon_bytes, prefer_tb, vmem_budget):
    """Largest batch tile whose streamed tiles + loop temps fit the remaining
    VMEM budget, preferring >= 2 grid tiles so ("parallel",) can split work
    across megacore TensorCores."""
    def fits(tb):
        streamed = 2 * tb * E * (embed_bytes + recon_bytes)    # double-buffered tiles
        temps = 3 * tb * NF * 4                                # project / p / sparse
        return streamed + temps <= vmem_budget

    cands = [tb for tb in (256, 128, 64, 32, 16, 8)
             if tb <= prefer_tb and tb <= B and B % tb == 0 and fits(tb)]
    for tb in cands:                      # descending: largest first
        if B // tb >= 2:
            return tb
    return cands[0] if cands else B


def autoencoder_forward(embed, prepared, *, topk, batch_block=None):
    """Returns (embed_recon, undead_recon, feat_counts).

    undead_recon is None (dead_cutoff=None default path)."""
    B, E = embed.shape
    NF = prepared["w_enc_t"].shape[1]
    recon_dtype = embed.dtype
    embed_bytes = jnp.dtype(embed.dtype).itemsize
    recon_bytes = jnp.dtype(recon_dtype).itemsize

    prefer_tb, vmem_cap = _tpu_generation_and_vmem()
    # Resident (single-buffered) bf16 weights + f32 biases.
    resident = 2 * (E * NF * 2) + 2 * (E * 4)
    headroom = 8 << 20

    if batch_block is None:
        batch_block = _pick_batch_block(
            B, E, NF, embed_bytes, recon_bytes, prefer_tb,
            max(vmem_cap - headroom - resident, 4 << 20))
    if B % batch_block != 0:
        raise ValueError(f"batch {B} not divisible by batch_block {batch_block}")
    num_tiles = B // batch_block

    # Serial dependence through `p`: partial unroll keeps LLO visibility
    # without blowing up code size for large topk.
    unroll = topk if topk < 16 else 8
    kernel = functools.partial(autoencoder_kernel, topk, unroll)

    # Advisory cost estimate so XLA can overlap the custom call with neighbours.
    cost = pl.CostEstimate(
        flops=2 * 2 * B * NF * E,
        transcendentals=B,
        bytes_accessed=(2 * E * NF * 2) + B * E * (embed_bytes + recon_bytes)
                       + num_tiles * NF * 4 + 2 * E * 4)

    # VMEM budget: resident weights + double-buffered streamed tiles +
    # in-kernel (TB, NF) temps, clamped to the real per-core capacity.
    streamed = 2 * batch_block * E * (embed_bytes + recon_bytes)
    temps = 3 * batch_block * NF * 4
    vmem_limit = int(min(max(resident + streamed + temps + (4 << 20), 32 << 20),
                         max(vmem_cap - (4 << 20), 32 << 20)))

    def build(resident_mode):
        def resident_spec(shape):
            index_map = lambda i, _s=shape: (0,) * len(_s)
            if resident_mode is None:
                return pl.BlockSpec(shape, index_map)
            return pl.BlockSpec(shape, index_map, pipeline_mode=resident_mode)

        return pl.pallas_call(
            kernel,
            grid=(num_tiles,),
            in_specs=[
                pl.BlockSpec((batch_block, E), lambda i: (i, 0)),  # embed tile (pipelined)
                resident_spec((1, E)),                             # enc bias (resident)
                resident_spec((E, NF)),                            # W_enc^T bf16 (resident)
                resident_spec((NF, E)),                            # W_dec bf16 (resident)
                resident_spec((1, E)),                             # dec bias (resident)
            ],
            out_specs=[
                pl.BlockSpec((batch_block, E), lambda i: (i, 0)),  # recon tile
                pl.BlockSpec((1, 1, NF), lambda i: (i, 0, 0)),     # per-tile counts
            ],
            out_shape=[
                jax.ShapeDtypeStruct((B, E), recon_dtype),
                jax.ShapeDtypeStruct((num_tiles, 1, NF), jnp.int32),
            ],
            compiler_params=pltpu.CompilerParams(
                dimension_semantics=("parallel",),
                vmem_limit_bytes=vmem_limit),
            cost_estimate=cost,
        )

    args = (embed, prepared["enc_bias"], prepared["w_enc_t"],
            prepared["w_dec"], prepared["dec_bias"])
    try:
        # Constant-index residents single-buffered: halves their VMEM footprint.
        recon, counts = build(pl.Buffered(1))(*args)
    except Exception:
        # Fallback for jax builds that reject single-buffered pipeline_mode.
        recon, counts = build(None)(*args)

    feat_counts = jnp.sum(counts[:, 0, :], axis=0)                 # (NF,) int32
    # TODO(synk): dead_cutoff/dead_topk "undead" fuzzed re-selection path not
    # implemented; the default forward (dead_cutoff=None) returns None here.
    return recon, None, feat_counts


def update_usage_buffers(buffers, feat_counts, batch_size):
    """Mirrors the torch no_grad buffer updates (int32 instead of int64)."""
    total = feat_counts.astype(jnp.int32)
    test_usage = total
    eval_usage = buffers["eval_usage"] + total
    last_usage = (buffers["last_usage"] + batch_size) * (1 - jnp.minimum(total, 1))
    return {"test_usage": test_usage, "eval_usage": eval_usage,
            "last_usage": last_usage}


def _reference_forward(embed, params, topk):
    """Pure-JAX mirror of the PyTorch forward.  Matmul operands are cast to
    bf16 (f32 accumulation) to mirror the kernel's MXU numerics; everything
    else (top-k, gather decode, normalize, bincount) follows the module."""
    w_enc = params["w_enc"]
    w_dec = params["w_dec"]
    x0 = embed - params["enc_bias"][None, :]
    project = jnp.dot(x0.astype(jnp.bfloat16), w_enc.T.astype(jnp.bfloat16),
                      preferred_element_type=jnp.float32)
    weights, feats = jax.lax.top_k(project, topk)
    vecs = w_dec.astype(jnp.bfloat16)[feats]                       # (B, K, E)
    base = jnp.einsum("bke,bk->be", vecs, weights.astype(jnp.bfloat16),
                      preferred_element_type=jnp.float32)
    base = base + params["dec_bias"][None, :]
    norm = jnp.sqrt(jnp.sum(base * base, axis=-1, keepdims=True))
    recon = base / jnp.maximum(norm, 1e-12)
    counts = jnp.zeros((w_enc.shape[0],), jnp.int32).at[feats.reshape(-1)].add(1)
    return recon, counts


if __name__ == "__main__":
    # Small but lane/sublane-aligned shapes (E, NF multiples of 128; batch
    # tile a multiple of 8) so no masked partial stores are generated.
    batch, embed_size, num_features, topk = 32, 128, 256, 4

    key = jax.random.PRNGKey(0)
    k_embed, k_w, k_bias = jax.random.split(key, 3)

    # Deterministic synthetic parameters (mimicking init_weights: bias tied,
    # decoder lookup = row-normalized encoder weight).
    w_enc = jax.random.normal(k_w, (num_features, embed_size), jnp.float32)
    w_enc = w_enc / jnp.sqrt(jnp.float32(embed_size))
    w_dec = w_enc / jnp.linalg.norm(w_enc, axis=-1, keepdims=True)
    enc_bias = 0.1 * jax.random.normal(k_bias, (embed_size,), jnp.float32)
    params = {"w_enc": w_enc, "w_dec": w_dec,
              "enc_bias": enc_bias, "dec_bias": enc_bias}  # pin_bias=True

    prepared = prepare_params(params)   # one-time layout/dtype prep

    buffers = {"last_usage": jnp.zeros((num_features,), jnp.int32),
               "eval_usage": jnp.zeros((num_features,), jnp.int32),
               "test_usage": jnp.zeros((num_features,), jnp.int32)}

    embed = jax.random.normal(k_embed, (batch, embed_size), jnp.float32)

    # batch_block auto-derived from the VMEM budget (picks >= 2 tiles here, so
    # the batch pipeline / parallel grid axis is exercised even at demo size).
    recon, undead, counts = autoencoder_forward(embed, prepared, topk=topk)
    recon = jax.block_until_ready(recon)
    counts = jax.block_until_ready(counts)
    buffers = update_usage_buffers(buffers, counts, batch)
    jax.block_until_ready(buffers["last_usage"])

    # Check against a pure-JAX reference of the PyTorch forward.
    ref_recon, ref_counts = _reference_forward(embed, params, topk)
    assert recon.shape == (batch, embed_size)
    assert jnp.allclose(recon, ref_recon, atol=5e-3, rtol=5e-3), "recon mismatch"
    assert jnp.array_equal(counts, ref_counts), "usage-count mismatch"
    assert undead is None

    print("KERNEL_OK")
</pallas_src>

<mosaic_0001>
module attributes {stable_mosaic.version = 11 : i64} {
  func.func @autoencoder_kernel(%arg0: i32, %arg1: memref<16x128xf32, #tpu.memory_space<vmem>>, %arg2: memref<1x128xf32, #tpu.memory_space<vmem>>, %arg3: memref<128x256xbf16, #tpu.memory_space<vmem>>, %arg4: memref<256x128xbf16, #tpu.memory_space<vmem>>, %arg5: memref<1x128xf32, #tpu.memory_space<vmem>>, %arg6: memref<16x128xf32, #tpu.memory_space<vmem>>, %arg7: memref<1x1x256xi32, #tpu.memory_space<vmem>>) attributes {dimension_semantics = [#tpu.dimension_semantics<parallel>], iteration_bounds = array<i64: 2>, scalar_prefetch = 0 : i64, scratch_operands = 0 : i64, tpu.core_type = #tpu.core_type<tc>, window_params = [{transform_indices = @transform_0, window_bounds = array<i64: 16, 128>}, {pipeline_mode = #tpu.pipeline_mode<synchronous>, transform_indices = @transform_1, window_bounds = array<i64: 1, 128>}, {pipeline_mode = #tpu.pipeline_mode<synchronous>, transform_indices = @transform_2, window_bounds = array<i64: 128, 256>}, {pipeline_mode = #tpu.pipeline_mode<synchronous>, transform_indices = @transform_3, window_bounds = array<i64: 256, 128>}, {pipeline_mode = #tpu.pipeline_mode<synchronous>, transform_indices = @transform_4, window_bounds = array<i64: 1, 128>}, {transform_indices = @transform_5, window_bounds = array<i64: 16, 128>}, {transform_indices = @transform_6, window_bounds = array<i64: 1, 1, 256>}]} {
    %c0 = arith.constant 0 : index
    %c0_0 = arith.constant 0 : index
    %0 = vector.load %arg1[%c0, %c0_0] : memref<16x128xf32, #tpu.memory_space<vmem>>, vector<16x128xf32>
    %c0_1 = arith.constant 0 : index
    %c0_2 = arith.constant 0 : index
    %1 = vector.load %arg2[%c0_1, %c0_2] : memref<1x128xf32, #tpu.memory_space<vmem>>, vector<1x128xf32>
    %2 = vector.broadcast %1 : vector<1x128xf32> to vector<16x128xf32>
    %3 = arith.subf %0, %2 : vector<16x128xf32>
    %4 = arith.truncf %3 : vector<16x128xf32> to vector<16x128xbf16>
    %c0_3 = arith.constant 0 : index
    %c0_4 = arith.constant 0 : index
    %5 = vector.load %arg3[%c0_3, %c0_4] : memref<128x256xbf16, #tpu.memory_space<vmem>>, vector<128x256xbf16>
    %cst = arith.constant dense<0.000000e+00> : vector<16x256xf32>
    %6 = tpu.matmul %4, %5, %cst {dimension_numbers = #tpu.dot_dimension_numbers<[1], [0], [0], [1], [0, 0, 1, 1], [], []>} : vector<16x128xbf16>, vector<128x256xbf16>, vector<16x256xf32> -> vector<16x256xf32>
    %cst_5 = arith.constant 0.000000e+00 : f32
    %cst_6 = arith.constant 3.000000e+38 : f32
    %7 = arith.subf %cst_5, %cst_6 : f32
    %cst_7 = arith.constant 3.000000e+38 : f32
    %8 = vector.broadcast %7 : f32 to vector<16x256xf32>
    %9 = arith.maximumf %8, %6 : vector<16x256xf32>
    %10 = vector.broadcast %cst_7 : f32 to vector<16x256xf32>
    %11 = arith.minimumf %10, %9 : vector<16x256xf32>
    %12 = tpu.iota {dimensions = array<i32: 1>} : vector<1x256xi32>
    %cst_8 = arith.constant 0xFF800000 : f32
    %c0_i32 = arith.constant 0 : i32
    %cst_9 = arith.constant dense<0xFF800000> : vector<16xf32>
    %13 = vector.multi_reduction <maximumf>, %11, %cst_9 [1] : vector<16x256xf32> to vector<16xf32>
    %14 = vector.shape_cast %13 : vector<16xf32> to vector<16x1xf32>
    %15 = vector.broadcast %14 : vector<16x1xf32> to vector<16x256xf32>
    %16 = arith.cmpf oeq, %11, %15 : vector<16x256xf32>
    %c256_i32 = arith.constant 256 : i32
    %17 = vector.shape_cast %12 : vector<1x256xi32> to vector<1x256xi32>
    %18 = vector.broadcast %17 : vector<1x256xi32> to vector<16x256xi32>
    %19 = vector.broadcast %c256_i32 : i32 to vector<16x256xi32>
    %20 = arith.select %16, %18, %19 : vector<16x256xi1>, vector<16x256xi32>
    %cst_10 = arith.constant dense<2147483647> : vector<16xi32>
    %21 = vector.multi_reduction <minsi>, %20, %cst_10 [1] : vector<16x256xi32> to vector<16xi32>
    %22 = vector.shape_cast %21 : vector<16xi32> to vector<16x1xi32>
    %23 = vector.broadcast %12 : vector<1x256xi32> to vector<16x256xi32>
    %24 = vector.broadcast %22 : vector<16x1xi32> to vector<16x256xi32>
    %25 = arith.cmpi eq, %23, %24 : vector<16x256xi32>
    %26 = vector.broadcast %cst_8 : f32 to vector<16x256xf32>
    %27 = arith.select %25, %26, %11 : vector<16x256xi1>, vector<16x256xf32>
    %c1_i32 = arith.constant 1 : i32
    %cst_11 = arith.constant dense<0xFF800000> : vector<16xf32>
    %28 = vector.multi_reduction <maximumf>, %27, %cst_11 [1] : vector<16x256xf32> to vector<16xf32>
    %29 = vector.shape_cast %28 : vector<16xf32> to vector<16x1xf32>
    %30 = vector.broadcast %29 : vector<16x1xf32> to vector<16x256xf32>
    %31 = arith.cmpf oeq, %27, %30 : vector<16x256xf32>
    %c256_i32_12 = arith.constant 256 : i32
    %32 = vector.shape_cast %12 : vector<1x256xi32> to vector<1x256xi32>
    %33 = vector.broadcast %32 : vector<1x256xi32> to vector<16x256xi32>
    %34 = vector.broadcast %c256_i32_12 : i32 to vector<16x256xi32>
    %35 = arith.select %31, %33, %34 : vector<16x256xi1>, vector<16x256xi32>
    %cst_13 = arith.constant dense<2147483647> : vector<16xi32>
    %36 = vector.multi_reduction <minsi>, %35, %cst_13 [1] : vector<16x256xi32> to vector<16xi32>
    %37 = vector.shape_cast %36 : vector<16xi32> to vector<16x1xi32>
    %38 = vector.broadcast %12 : vector<1x256xi32> to vector<16x256xi32>
    %39 = vector.broadcast %37 : vector<16x1xi32> to vector<16x256xi32>
    %40 = arith.cmpi eq, %38, %39 : vector<16x256xi32>
    %41 = vector.broadcast %cst_8 : f32 to vector<16x256xf32>
    %42 = arith.select %40, %41, %27 : vector<16x256xi1>, vector<16x256xf32>
    %c2_i32 = arith.constant 2 : i32
    %cst_14 = arith.constant dense<0xFF800000> : vector<16xf32>
    %43 = vector.multi_reduction <maximumf>, %42, %cst_14 [1] : vector<16x256xf32> to vector<16xf32>
    %44 = vector.shape_cast %43 : vector<16xf32> to vector<16x1xf32>
    %45 = vector.broadcast %44 : vector<16x1xf32> to vector<16x256xf32>
    %46 = arith.cmpf oeq, %42, %45 : vector<16x256xf32>
    %c256_i32_15 = arith.constant 256 : i32
    %47 = vector.shape_cast %12 : vector<1x256xi32> to vector<1x256xi32>
    %48 = vector.broadcast %47 : vector<1x256xi32> to vector<16x256xi32>
    %49 = vector.broadcast %c256_i32_15 : i32 to vector<16x256xi32>
    %50 = arith.select %46, %48, %49 : vector<16x256xi1>, vector<16x256xi32>
    %cst_16 = arith.constant dense<2147483647> : vector<16xi32>
    %51 = vector.multi_reduction <minsi>, %50, %cst_16 [1] : vector<16x256xi32> to vector<16xi32>
    %52 = vector.shape_cast %51 : vector<16xi32> to vector<16x1xi32>
    %53 = vector.broadcast %12 : vector<1x256xi32> to vector<16x256xi32>
    %54 = vector.broadcast %52 : vector<16x1xi32> to vector<16x256xi32>
    %55 = arith.cmpi eq, %53, %54 : vector<16x256xi32>
    %56 = vector.broadcast %cst_8 : f32 to vector<16x256xf32>
    %57 = arith.select %55, %56, %42 : vector<16x256xi1>, vector<16x256xf32>
    %c3_i32 = arith.constant 3 : i32
    %cst_17 = arith.constant dense<0xFF800000> : vector<16xf32>
    %58 = vector.multi_reduction <maximumf>, %57, %cst_17 [1] : vector<16x256xf32> to vector<16xf32>
    %59 = vector.shape_cast %58 : vector<16xf32> to vector<16x1xf32>
    %60 = vector.broadcast %59 : vector<16x1xf32> to vector<16x256xf32>
    %61 = arith.cmpf oeq, %57, %60 : vector<16x256xf32>
    %c256_i32_18 = arith.constant 256 : i32
    %62 = vector.shape_cast %12 : vector<1x256xi32> to vector<1x256xi32>
    %63 = vector.broadcast %62 : vector<1x256xi32> to vector<16x256xi32>
    %64 = vector.broadcast %c256_i32_18 : i32 to vector<16x256xi32>
    %65 = arith.select %61, %63, %64 : vector<16x256xi1>, vector<16x256xi32>
    %cst_19 = arith.constant dense<2147483647> : vector<16xi32>
    %66 = vector.multi_reduction <minsi>, %65, %cst_19 [1] : vector<16x256xi32> to vector<16xi32>
    %67 = vector.shape_cast %66 : vector<16xi32> to vector<16x1xi32>
    %68 = vector.broadcast %12 : vector<1x256xi32> to vector<16x256xi32>
    %69 = vector.broadcast %67 : vector<16x1xi32> to vector<16x256xi32>
    %70 = arith.cmpi eq, %68, %69 : vector<16x256xi32>
    %71 = vector.broadcast %cst_8 : f32 to vector<16x256xf32>
    %72 = arith.select %70, %71, %57 : vector<16x256xi1>, vector<16x256xf32>
    %cst_20 = arith.constant 0xFF800000 : f32
    %73 = vector.broadcast %cst_20 : f32 to vector<16x256xf32>
    %74 = arith.cmpf oeq, %72, %73 : vector<16x256xf32>
    %75 = arith.extui %74 : vector<16x256xi1> to vector<16x256xi32>
    %cst_21 = arith.constant dense<0> : vector<256xi32>
    %76 = vector.multi_reduction <add>, %75, %cst_21 [0] : vector<16x256xi32> to vector<256xi32>
    %77 = vector.shape_cast %76 : vector<256xi32> to vector<1x256xi32>
    %c0_22 = arith.constant 0 : index
    %c0_23 = arith.constant 0 : index
    %c0_24 = arith.constant 0 : index
    %78 = vector.load %arg7[%c0_22, %c0_23, %c0_24] : memref<1x1x256xi32, #tpu.memory_space<vmem>>, vector<1x1x256xi32>
    %79 = vector.shape_cast %78 : vector<1x1x256xi32> to vector<1x256xi32>
    %80 = vector.shape_cast %77 : vector<1x256xi32> to vector<1x1x256xi32>
    tpu.vector_store %arg7[%c0_22, %c0_23, %c0_24], %80 {strides = array<i32>} : memref<1x1x256xi32, #tpu.memory_space<vmem>>, vector<1x1x256xi32>,
    %cst_25 = arith.constant 0.000000e+00 : f32
    %81 = vector.broadcast %cst_25 : f32 to vector<16x256xf32>
    %82 = arith.select %74, %11, %81 : vector<16x256xi1>, vector<16x256xf32>
    %83 = arith.truncf %82 : vector<16x256xf32> to vector<16x256xbf16>
    %c0_26 = arith.constant 0 : index
    %c0_27 = arith.constant 0 : index
    %84 = vector.load %arg4[%c0_26, %c0_27] : memref<256x128xbf16, #tpu.memory_space<vmem>>, vector<256x128xbf16>
    %cst_28 = arith.constant dense<0.000000e+00> : vector<16x128xf32>
    %85 = tpu.matmul %83, %84, %cst_28 {dimension_numbers = #tpu.dot_dimension_numbers<[1], [0], [0], [1], [0, 0, 1, 1], [], []>} : vector<16x256xbf16>, vector<256x128xbf16>, vector<16x128xf32> -> vector<16x128xf32>
    %c0_29 = arith.constant 0 : index
    %c0_30 = arith.constant 0 : index
    %86 = vector.load %arg5[%c0_29, %c0_30] : memref<1x128xf32, #tpu.memory_space<vmem>>, vector<1x128xf32>
    %87 = vector.broadcast %86 : vector<1x128xf32> to vector<16x128xf32>
    %88 = arith.addf %85, %87 : vector<16x128xf32>
    %89 = arith.mulf %88, %88 : vector<16x128xf32>
    %cst_31 = arith.constant dense<0.000000e+00> : vector<16xf32>
    %90 = vector.multi_reduction <add>, %89, %cst_31 [1] : vector<16x128xf32> to vector<16xf32>
    %91 = vector.shape_cast %90 : vector<16xf32> to vector<16x1xf32>
    %cst_32 = arith.constant 1.000000e-24 : f32
    %92 = vector.broadcast %cst_32 : f32 to vector<16x1xf32>
    %93 = arith.maximumf %91, %92 : vector<16x1xf32>
    %94 = math.rsqrt %93 : vector<16x1xf32>
    %95 = vector.broadcast %94 : vector<16x1xf32> to vector<16x128xf32>
    %96 = arith.mulf %88, %95 : vector<16x128xf32>
    %c0_33 = arith.constant 0 : index
    %c0_34 = arith.constant 0 : index
    %97 = vector.load %arg6[%c0_33, %c0_34] : memref<16x128xf32, #tpu.memory_space<vmem>>, vector<16x128xf32>
    tpu.vector_store %arg6[%c0_33, %c0_34], %96 {strides = array<i32>} : memref<16x128xf32, #tpu.memory_space<vmem>>, vector<16x128xf32>,
    return
  }
  func.func @transform_0(%arg0: i32) -> (i32, i32) {
    %c0_i32 = arith.constant 0 : i32
    %c0_i32_0 = arith.constant 0 : i32
    return %arg0, %c0_i32 : i32, i32
  }
  func.func @transform_1(%arg0: i32) -> (i32, i32) {
    %c0_i32 = arith.constant 0 : i32
    %c0_i32_0 = arith.constant 0 : i32
    %c0_i32_1 = arith.constant 0 : i32
    return %c0_i32, %c0_i32_0 : i32, i32
  }
  func.func @transform_2(%arg0: i32) -> (i32, i32) {
    %c0_i32 = arith.constant 0 : i32
    %c0_i32_0 = arith.constant 0 : i32
    %c0_i32_1 = arith.constant 0 : i32
    return %c0_i32, %c0_i32_0 : i32, i32
  }
  func.func @transform_3(%arg0: i32) -> (i32, i32) {
    %c0_i32 = arith.constant 0 : i32
    %c0_i32_0 = arith.constant 0 : i32
    %c0_i32_1 = arith.constant 0 : i32
    return %c0_i32, %c0_i32_0 : i32, i32
  }
  func.func @transform_4(%arg0: i32) -> (i32, i32) {
    %c0_i32 = arith.constant 0 : i32
    %c0_i32_0 = arith.constant 0 : i32
    %c0_i32_1 = arith.constant 0 : i32
    return %c0_i32, %c0_i32_0 : i32, i32
  }
  func.func @transform_5(%arg0: i32) -> (i32, i32) {
    %c0_i32 = arith.constant 0 : i32
    %c0_i32_0 = arith.constant 0 : i32
    return %arg0, %c0_i32 : i32, i32
  }
  func.func @transform_6(%arg0: i32) -> (i32, i32, i32) {
    %c0_i32 = arith.constant 0 : i32
    %c0_i32_0 = arith.constant 0 : i32
    %c0_i32_1 = arith.constant 0 : i32
    return %arg0, %c0_i32, %c0_i32_0 : i32, i32, i32
  }
}

module attributes {stable_mosaic.version = 11 : i64} {
  func.func @autoencoder_kernel(%arg0: i32, %arg1: memref<16x128xf32, #tpu.memory_space<vmem>>, %arg2: memref<1x128xf32, #tpu.memory_space<vmem>>, %arg3: memref<128x256xbf16, #tpu.memory_space<vmem>>, %arg4: memref<256x128xbf16, #tpu.memory_space<vmem>>, %arg5: memref<1x128xf32, #tpu.memory_space<vmem>>, %arg6: memref<16x128xf32, #tpu.memory_space<vmem>>, %arg7: memref<1x1x256xi32, #tpu.memory_space<vmem>>) attributes {dimension_semantics = [#tpu.dimension_semantics<parallel>], iteration_bounds = array<i64: 2>, scalar_prefetch = 0 : i64, scratch_operands = 0 : i64, tpu.core_type = #tpu.core_type<tc>, window_params = [{transform_indices = @transform_0, window_bounds = array<i64: 16, 128>}, {pipeline_mode = #tpu.pipeline_mode<synchronous>, transform_indices = @transform_1, window_bounds = array<i64: 1, 128>}, {pipeline_mode = #tpu.pipeline_mode<synchronous>, transform_indices = @transform_2, window_bounds = array<i64: 128, 256>}, {pipeline_mode = #tpu.pipeline_mode<synchronous>, transform_indices = @transform_3, window_bounds = array<i64: 256, 128>}, {pipeline_mode = #tpu.pipeline_mode<synchronous>, transform_indices = @transform_4, window_bounds = array<i64: 1, 128>}, {transform_indices = @transform_5, window_bounds = array<i64: 16, 128>}, {transform_indices = @transform_6, window_bounds = array<i64: 1, 1, 256>}]} {
    %c0 = arith.constant 0 : index
    %c0_0 = arith.constant 0 : index
    %0 = vector.load %arg1[%c0, %c0_0] : memref<16x128xf32, #tpu.memory_space<vmem>>, vector<16x128xf32>
    %c0_1 = arith.constant 0 : index
    %c0_2 = arith.constant 0 : index
    %1 = vector.load %arg2[%c0_1, %c0_2] : memref<1x128xf32, #tpu.memory_space<vmem>>, vector<1x128xf32>
    %2 = vector.broadcast %1 : vector<1x128xf32> to vector<16x128xf32>
    %3 = arith.subf %0, %2 : vector<16x128xf32>
    %4 = arith.truncf %3 : vector<16x128xf32> to vector<16x128xbf16>
    %c0_3 = arith.constant 0 : index
    %c0_4 = arith.constant 0 : index
    %5 = vector.load %arg3[%c0_3, %c0_4] : memref<128x256xbf16, #tpu.memory_space<vmem>>, vector<128x256xbf16>
    %cst = arith.constant dense<0.000000e+00> : vector<16x256xf32>
    %6 = tpu.matmul %4, %5, %cst {dimension_numbers = #tpu.dot_dimension_numbers<[1], [0], [0], [1], [0, 0, 1, 1], [], []>} : vector<16x128xbf16>, vector<128x256xbf16>, vector<16x256xf32> -> vector<16x256xf32>
    %cst_5 = arith.constant 0.000000e+00 : f32
    %cst_6 = arith.constant 3.000000e+38 : f32
    %7 = arith.subf %cst_5, %cst_6 : f32
    %cst_7 = arith.constant 3.000000e+38 : f32
    %8 = vector.broadcast %7 : f32 to vector<16x256xf32>
    %9 = arith.maximumf %8, %6 : vector<16x256xf32>
    %10 = vector.broadcast %cst_7 : f32 to vector<16x256xf32>
    %11 = arith.minimumf %10, %9 : vector<16x256xf32>
    %12 = tpu.iota {dimensions = array<i32: 1>} : vector<1x256xi32>
    %cst_8 = arith.constant 0xFF800000 : f32
    %c0_i32 = arith.constant 0 : i32
    %cst_9 = arith.constant dense<0xFF800000> : vector<16xf32>
    %13 = vector.multi_reduction <maximumf>, %11, %cst_9 [1] : vector<16x256xf32> to vector<16xf32>
    %14 = vector.shape_cast %13 : vector<16xf32> to vector<16x1xf32>
    %15 = vector.broadcast %14 : vector<16x1xf32> to vector<16x256xf32>
    %16 = arith.cmpf oeq, %11, %15 : vector<16x256xf32>
    %c256_i32 = arith.constant 256 : i32
    %17 = vector.shape_cast %12 : vector<1x256xi32> to vector<1x256xi32>
    %18 = vector.broadcast %17 : vector<1x256xi32> to vector<16x256xi32>
    %19 = vector.broadcast %c256_i32 : i32 to vector<16x256xi32>
    %20 = arith.select %16, %18, %19 : vector<16x256xi1>, vector<16x256xi32>
    %cst_10 = arith.constant dense<2147483647> : vector<16xi32>
    %21 = vector.multi_reduction <minsi>, %20, %cst_10 [1] : vector<16x256xi32> to vector<16xi32>
    %22 = vector.shape_cast %21 : vector<16xi32> to vector<16x1xi32>
    %23 = vector.broadcast %12 : vector<1x256xi32> to vector<16x256xi32>
    %24 = vector.broadcast %22 : vector<16x1xi32> to vector<16x256xi32>
    %25 = arith.cmpi eq, %23, %24 : vector<16x256xi32>
    %26 = vector.broadcast %cst_8 : f32 to vector<16x256xf32>
    %27 = arith.select %25, %26, %11 : vector<16x256xi1>, vector<16x256xf32>
    %c1_i32 = arith.constant 1 : i32
    %cst_11 = arith.constant dense<0xFF800000> : vector<16xf32>
    %28 = vector.multi_reduction <maximumf>, %27, %cst_11 [1] : vector<16x256xf32> to vector<16xf32>
    %29 = vector.shape_cast %28 : vector<16xf32> to vector<16x1xf32>
    %30 = vector.broadcast %29 : vector<16x1xf32> to vector<16x256xf32>
    %31 = arith.cmpf oeq, %27, %30 : vector<16x256xf32>
    %c256_i32_12 = arith.constant 256 : i32
    %32 = vector.shape_cast %12 : vector<1x256xi32> to vector<1x256xi32>
    %33 = vector.broadcast %32 : vector<1x256xi32> to vector<16x256xi32>
    %34 = vector.broadcast %c256_i32_12 : i32 to vector<16x256xi32>
    %35 = arith.select %31, %33, %34 : vector<16x256xi1>, vector<16x256xi32>
    %cst_13 = arith.constant dense<2147483647> : vector<16xi32>
    %36 = vector.multi_reduction <minsi>, %35, %cst_13 [1] : vector<16x256xi32> to vector<16xi32>
    %37 = vector.shape_cast %36 : vector<16xi32> to vector<16x1xi32>
    %38 = vector.broadcast %12 : vector<1x256xi32> to vector<16x256xi32>
    %39 = vector.broadcast %37 : vector<16x1xi32> to vector<16x256xi32>
    %40 = arith.cmpi eq, %38, %39 : vector<16x256xi32>
    %41 = vector.broadcast %cst_8 : f32 to vector<16x256xf32>
    %42 = arith.select %40, %41, %27 : vector<16x256xi1>, vector<16x256xf32>
    %c2_i32 = arith.constant 2 : i32
    %cst_14 = arith.constant dense<0xFF800000> : vector<16xf32>
    %43 = vector.multi_reduction <maximumf>, %42, %cst_14 [1] : vector<16x256xf32> to vector<16xf32>
    %44 = vector.shape_cast %43 : vector<16xf32> to vector<16x1xf32>
    %45 = vector.broadcast %44 : vector<16x1xf32> to vector<16x256xf32>
    %46 = arith.cmpf oeq, %42, %45 : vector<16x256xf32>
    %c256_i32_15 = arith.constant 256 : i32
    %47 = vector.shape_cast %12 : vector<1x256xi32> to vector<1x256xi32>
    %48 = vector.broadcast %47 : vector<1x256xi32> to vector<16x256xi32>
    %49 = vector.broadcast %c256_i32_15 : i32 to vector<16x256xi32>
    %50 = arith.select %46, %48, %49 : vector<16x256xi1>, vector<16x256xi32>
    %cst_16 = arith.constant dense<2147483647> : vector<16xi32>
    %51 = vector.multi_reduction <minsi>, %50, %cst_16 [1] : vector<16x256xi32> to vector<16xi32>
    %52 = vector.shape_cast %51 : vector<16xi32> to vector<16x1xi32>
    %53 = vector.broadcast %12 : vector<1x256xi32> to vector<16x256xi32>
    %54 = vector.broadcast %52 : vector<16x1xi32> to vector<16x256xi32>
    %55 = arith.cmpi eq, %53, %54 : vector<16x256xi32>
    %56 = vector.broadcast %cst_8 : f32 to vector<16x256xf32>
    %57 = arith.select %55, %56, %42 : vector<16x256xi1>, vector<16x256xf32>
    %c3_i32 = arith.constant 3 : i32
    %cst_17 = arith.constant dense<0xFF800000> : vector<16xf32>
    %58 = vector.multi_reduction <maximumf>, %57, %cst_17 [1] : vector<16x256xf32> to vector<16xf32>
    %59 = vector.shape_cast %58 : vector<16xf32> to vector<16x1xf32>
    %60 = vector.broadcast %59 : vector<16x1xf32> to vector<16x256xf32>
    %61 = arith.cmpf oeq, %57, %60 : vector<16x256xf32>
    %c256_i32_18 = arith.constant 256 : i32
    %62 = vector.shape_cast %12 : vector<1x256xi32> to vector<1x256xi32>
    %63 = vector.broadcast %62 : vector<1x256xi32> to vector<16x256xi32>
    %64 = vector.broadcast %c256_i32_18 : i32 to vector<16x256xi32>
    %65 = arith.select %61, %63, %64 : vector<16x256xi1>, vector<16x256xi32>
    %cst_19 = arith.constant dense<2147483647> : vector<16xi32>
    %66 = vector.multi_reduction <minsi>, %65, %cst_19 [1] : vector<16x256xi32> to vector<16xi32>
    %67 = vector.shape_cast %66 : vector<16xi32> to vector<16x1xi32>
    %68 = vector.broadcast %12 : vector<1x256xi32> to vector<16x256xi32>
    %69 = vector.broadcast %67 : vector<16x1xi32> to vector<16x256xi32>
    %70 = arith.cmpi eq, %68, %69 : vector<16x256xi32>
    %71 = vector.broadcast %cst_8 : f32 to vector<16x256xf32>
    %72 = arith.select %70, %71, %57 : vector<16x256xi1>, vector<16x256xf32>
    %cst_20 = arith.constant 0xFF800000 : f32
    %73 = vector.broadcast %cst_20 : f32 to vector<16x256xf32>
    %74 = arith.cmpf oeq, %72, %73 : vector<16x256xf32>
    %75 = arith.extui %74 : vector<16x256xi1> to vector<16x256xi32>
    %cst_21 = arith.constant dense<0> : vector<256xi32>
    %76 = vector.multi_reduction <add>, %75, %cst_21 [0] : vector<16x256xi32> to vector<256xi32>
    %77 = vector.shape_cast %76 : vector<256xi32> to vector<1x256xi32>
    %c0_22 = arith.constant 0 : index
    %c0_23 = arith.constant 0 : index
    %c0_24 = arith.constant 0 : index
    %78 = vector.load %arg7[%c0_22, %c0_23, %c0_24] : memref<1x1x256xi32, #tpu.memory_space<vmem>>, vector<1x1x256xi32>
    %79 = vector.shape_cast %78 : vector<1x1x256xi32> to vector<1x256xi32>
    %80 = vector.shape_cast %77 : vector<1x256xi32> to vector<1x1x256xi32>
    tpu.vector_store %arg7[%c0_22, %c0_23, %c0_24], %80 {strides = array<i32>} : memref<1x1x256xi32, #tpu.memory_space<vmem>>, vector<1x1x256xi32>,
    %cst_25 = arith.constant 0.000000e+00 : f32
    %81 = vector.broadcast %cst_25 : f32 to vector<16x256xf32>
    %82 = arith.select %74, %11, %81 : vector<16x256xi1>, vector<16x256xf32>
    %83 = arith.truncf %82 : vector<16x256xf32> to vector<16x256xbf16>
    %c0_26 = arith.constant 0 : index
    %c0_27 = arith.constant 0 : index
    %84 = vector.load %arg4[%c0_26, %c0_27] : memref<256x128xbf16, #tpu.memory_space<vmem>>, vector<256x128xbf16>
    %cst_28 = arith.constant dense<0.000000e+00> : vector<16x128xf32>
    %85 = tpu.matmul %83, %84, %cst_28 {dimension_numbers = #tpu.dot_dimension_numbers<[1], [0], [0], [1], [0, 0, 1, 1], [], []>} : vector<16x256xbf16>, vector<256x128xbf16>, vector<16x128xf32> -> vector<16x128xf32>
    %c0_29 = arith.constant 0 : index
    %c0_30 = arith.constant 0 : index
    %86 = vector.load %arg5[%c0_29, %c0_30] : memref<1x128xf32, #tpu.memory_space<vmem>>, vector<1x128xf32>
    %87 = vector.broadcast %86 : vector<1x128xf32> to vector<16x128xf32>
    %88 = arith.addf %85, %87 : vector<16x128xf32>
    %89 = arith.mulf %88, %88 : vector<16x128xf32>
    %cst_31 = arith.constant dense<0.000000e+00> : vector<16xf32>
    %90 = vector.multi_reduction <add>, %89, %cst_31 [1] : vector<16x128xf32> to vector<16xf32>
    %91 = vector.shape_cast %90 : vector<16xf32> to vector<16x1xf32>
    %cst_32 = arith.constant 1.000000e-24 : f32
    %92 = vector.broadcast %cst_32 : f32 to vector<16x1xf32>
    %93 = arith.maximumf %91, %92 : vector<16x1xf32>
    %94 = math.rsqrt %93 : vector<16x1xf32>
    %95 = vector.broadcast %94 : vector<16x1xf32> to vector<16x128xf32>
    %96 = arith.mulf %88, %95 : vector<16x128xf32>
    %c0_33 = arith.constant 0 : index
    %c0_34 = arith.constant 0 : index
    %97 = vector.load %arg6[%c0_33, %c0_34] : memref<16x128xf32, #tpu.memory_space<vmem>>, vector<16x128xf32>
    tpu.vector_store %arg6[%c0_33, %c0_34], %96 {strides = array<i32>} : memref<16x128xf32, #tpu.memory_space<vmem>>, vector<16x128xf32>,
    return
  }
  func.func @transform_0(%arg0: i32) -> (i32, i32) {
    %c0_i32 = arith.constant 0 : i32
    %c0_i32_0 = arith.constant 0 : i32
    return %arg0, %c0_i32 : i32, i32
  }
  func.func @transform_1(%arg0: i32) -> (i32, i32) {
    %c0_i32 = arith.constant 0 : i32
    %c0_i32_0 = arith.constant 0 : i32
    %c0_i32_1 = arith.constant 0 : i32
    return %c0_i32, %c0_i32_0 : i32, i32
  }
  func.func @transform_2(%arg0: i32) -> (i32, i32) {
    %c0_i32 = arith.constant 0 : i32
    %c0_i32_0 = arith.constant 0 : i32
    %c0_i32_1 = arith.constant 0 : i32
    return %c0_i32, %c0_i32_0 : i32, i32
  }
  func.func @transform_3(%arg0: i32) -> (i32, i32) {
    %c0_i32 = arith.constant 0 : i32
    %c0_i32_0 = arith.constant 0 : i32
    %c0_i32_1 = arith.constant 0 : i32
    return %c0_i32, %c0_i32_0 : i32, i32
  }
  func.func @transform_4(%arg0: i32) -> (i32, i32) {
    %c0_i32 = arith.constant 0 : i32
    %c0_i32_0 = arith.constant 0 : i32
    %c0_i32_1 = arith.constant 0 : i32
    return %c0_i32, %c0_i32_0 : i32, i32
  }
  func.func @transform_5(%arg0: i32) -> (i32, i32) {
    %c0_i32 = arith.constant 0 : i32
    %c0_i32_0 = arith.constant 0 : i32
    return %arg0, %c0_i32 : i32, i32
  }
  func.func @transform_6(%arg0: i32) -> (i32, i32, i32) {
    %c0_i32 = arith.constant 0 : i32
    %c0_i32_0 = arith.constant 0 : i32
    %c0_i32_1 = arith.constant 0 : i32
    return %arg0, %c0_i32, %c0_i32_0 : i32, i32, i32
  }
}

</mosaic_0001>

<bundles_post_ra>
// kernel: tpu_custom_call.1
= control target key start
LH: loop header
LB: loop body
LE: loop exit
PB: predicated region body
PF: predicated region fallthrough
CT: control target
= control target key end

     0   :  { %s1930_s0 = inlined_call_operand.hbm [shape: f32[32,128], index: 0, kind: input, shape index: {}]   ;;  %s1931_s1 = inlined_call_operand.hbm [shape: f32[1,128], index: 1, kind: input, shape index: {}]   ;;  %s1932_s2 = inlined_call_operand.hbm [shape: bf16[128,256], index: 2, kind: input, shape index: {}]   ;;  %s1933_s3 = inlined_call_operand.hbm [shape: bf16[256,128], index: 3, kind: input, shape index: {}]   ;;  %s1934_s4 = inlined_call_operand.vmem [shape: f32[1,128], index: 4, kind: input, shape index: {}]   ;;  %s1935_s5 = inlined_call_operand.hbm [shape: f32[32,128], index: 5, kind: output, shape index: {0}]   ;;  %s1936_s6 = inlined_call_operand.hbm [shape: s32[2,1,256], index: 6, kind: output, shape index: {1}]  }
   0x1   :  { %1940 = sst [smem:[#allocation18_spill]] %s1930_s0 }
   0x2   :  { %12 = vsyncpa [#allocation3], 0 }
   0x3   :  { %14 = vsyncpa [#allocation3 + $0x1], 0 }
   0x4   :  { %15 = vsyncpa [#allocation6], 0 }
   0x5   :  { %16 = vsyncpa [#allocation9], 0 }
   0x6   :  { %17 = vsyncpa [#allocation4], 0 }
   0x7   :  { %19 = vsyncpa [#allocation4 + $0x1], 0 }
   0x8   :  { %20 = vsyncpa [#allocation12], 0 }
   0x9   :  { %22 = vsyncpa [#allocation12 + $0x1], 0  ;;  %s1654_s21 = smov 0   ;;  %s1656_s22 = smov 0  }
   0xa   :  { %s1658_s23 = smov 0   ;;  %s1660_s24 = smov 0  }
   0xb LB: > { %s1675_s25 = sadd.s32 4294967295, %s1607_s24   ;;  %s1091_s26 = sadd.s32 4294967294, %s1607_s24   ;;  %s1607_s24 = sphi %s1660_s24, %s1955_s24   ;;  %s1603_s23 = sphi %s1658_s23, %s1954_s23   ;;  %s1599_s22 = sphi %s1656_s22, %s1953_s22   ;;  %s1595_s21 = sphi %s1654_s21, %s1952_s21  }
   0xc   : > { %p48_p0 = scmp.ne.s32.totalorder %s1599_s22, %s1595_s21  ;;  %p49_p1 = scmp.eq.s32.totalorder %s1675_s25, 0 }
   0xd   : > { %p156_p2 = scmp.eq.s32.totalorder %s1675_s25, 1  ;;  %p162_p3 = scmp.eq.s32.totalorder %s1091_s26, 1 }
   0xe   : > { %p1684_p4 = por %p49_p1, %p48_p0  ;;  %p1092_p5 = scmp.ge.s32.totalorder %s1607_s24, 1 }
   0xf   : > { %p1689_p6 = por %p162_p3, %p48_p0  ;;  %p195_p7 = scmp.lt.s32.totalorder %s1607_s24, 3 }
  0x10   : > { %s207_s7 = sshll.u32 %s1931_s1, 4  ;;  %s1609_s9 = smov [#allocation5]   ;;  %s208_s7 = int_to_ptr.hbm [resolvable:$true] %s207_s7 }
  0x11   : > { %p1697_p8 = pnand %p1092_p5, %p195_p7  ;;  %s209_s10 = sshll.u32 %s1609_s9, 4  ;;  %s210_s10 = int_to_ptr.vmem [resolvable:$true] %s209_s10 }
  0x12   : > { %s218_s13 = sshll.u32 %s1932_s2, 4  ;;  %s1610_s15 = smov [#allocation7]   ;;  %s219_s13 = int_to_ptr.hbm [resolvable:$true] %s218_s13 }
  0x13   : > { %p1304_p10 = pneg %p1697_p8  ;;  %s220_s16 = sshll.u32 %s1610_s15, 4  ;;  %s221_s16 = int_to_ptr.vmem [resolvable:$true] %s220_s16 }
  0x14   : > { %s1937_s17 = smov 128   ;;  %s1938_s18 = smov 8  }
  0x15   : > { %p1709_p11 = pnand %p1304_p10, %p49_p1  ;;  %s232_s26 = sshll.u32 %s1933_s3, 4  ;;  %s233_s26 = int_to_ptr.hbm [resolvable:$true] %s232_s26 }
  0x16   : > { %s1613_s29 = smov [#allocation8]   ;;  %s1615_s9 = smov 4  }
  0x17   : > { %1307 = dma.hbm_to_vmem [thread:$0]  (!%p1709_p11), %s208_s7, 16, %s210_s10, [#allocation6]  }
  0x18   : > { %1310 = dma.hbm_to_vmem [thread:$0]  (!%p1709_p11), %s219_s13, 2048, %s221_s16, [#allocation6], %s1937_s17, %s1937_s17, %s1938_s18  }
  0x19   : > { %s234_s30 = sshll.u32 %s1613_s29, 4  ;;  %s1614_s7 = smov 64   ;;  %s235_s30 = int_to_ptr.vmem [resolvable:$true] %s234_s30 }
  0x1a   : > { %1313 = dma.hbm_to_vmem [thread:$0]  (!%p1709_p11), %s233_s26, 2048, %s235_s30, [#allocation9], %s1614_s7, %s1614_s7, %s1615_s9  }
  0x1b   : > { %s1726_s10 = sadd.s32 1, %s1607_s24   ;;  %s35_s12 = sadd.s32 1, %s1603_s23 }
  0x1c   : > { %s32_s11 = ssub.s32 %s1607_s24, %s1726_s10  ;;  %p42_p13 = scmp.ne.s32.totalorder %s1603_s23, %s1599_s22 }
  0x1d   : > { %p33_p12 = scmp.eq.s32.totalorder %s32_s11, 0  ;;  %p43_p0 = scmp.eq.s32.totalorder %s1607_s24, 0 }
  0x1e   : > { %p1739_p3 = por %p156_p2, %p42_p13  ;;  %p1328_p5 = scmp.lt.s32.totalorder %s1607_s24, 2 }
  0x1f   : > { %s1735_s13 = scalar_select %p33_p12, %s1603_s23, %s35_s12  }
  0x20   : > { %s251_s16 = sand.u32 1, %s1603_s23   ;;  %s1252_s19 = sshll.u32 %s1607_s24, 4 }
  0x21   : > { %p44_p7 = por %p43_p0, %p42_p13  ;;  %s1097_s14 = sshll.u32 %s251_s16, 4 }
  0x22   : > { %s1946_s0 = sld [smem:[#allocation18_spill]]  ;;  %s255_s7 = scalar_lea.vmem [#allocation2], %s1097_s14 }
  0x23   : > { %s263_s9 = sshll.u32 %s255_s7, 4  ;;  %p1749_p10 = pnand %p1328_p5, %p44_p7  ;;  %s264_s9 = int_to_ptr.vmem [resolvable:$true] %s263_s9 }
  0x24   : > { %s252_s12 = scalar_lea.sflag [#allocation3], %s251_s16 }
  0x25   : > { %p1475_p11 = pneg %p1749_p10 }
  0x28   : > { %s260_s29 = scalar_lea.hbm %s1946_s0, %s1252_s19  ;;  %s1478_s14 = scalar_lea.hbm %s1946_s0, 32 }
  0x29   : > { %s261_s30 = sshll.u32 %s260_s29, 4  ;;  %s262_s30 = int_to_ptr.hbm [resolvable:$true] %s261_s30 }
  0x2a   : > { %s1471_s17 = sshra.s32 %s262_s30, 4  ;;  %s1472_s17 = int_to_ptr.hbm [resolvable:$true] %s1471_s17 }
  0x2b   : > { %s1473_s18 = scalar_lea.hbm %s1472_s17, 16  ;;  %p1479_p0 = scmp.lt.s32.totalorder %s1472_s17, %s1946_s0 }
  0x2c   : > { %p1474_p2 = scmp.ne.s32.totalorder %s1472_s17, %s1473_s18  ;;  %p1480_p5 = scmp.lt.s32.totalorder %s1478_s14, %s1473_s18 }
  0x2e   : > { %p1476_p12 = pnand %p1475_p11, %p1474_p2  ;;  %p1481_p7 = por %p1480_p5, %p1479_p0 }
  0x30   : > { %p1477_p13 = pneg %p1476_p12 }
  0x32   : > { %p1482_p9 = pnand %p1481_p7, %p1477_p13 }
  0x34   : > { %1485 = shalt.err (!%p1482_p9)
}
  0x35   : > { %s1948_s16 = smov 8   ;;  %s1949_s7 = smov 128  }
  0x36   : > { %1317 = dma.hbm_to_vmem [thread:$0]  (!%p1749_p10), %s262_s30, 256, %s264_s9, %s252_s12, %s1949_s7, %s1949_s7, %s1948_s16  }
  0x37   : > { %275 = sbr.rel (%p1697_p8) target bundleno = 1990 (0x7c6), region = 40  ;;  %s1769_s19 = sand.u32 (!%p1697_p8), 1, %s1599_s22  }
  0x38   : > { %s1939_s17 = sshll.u32 (!%p1697_p8), %s1769_s19, 4  ;;  %s278_s18 = scalar_lea.sflag (!%p1697_p8), [#allocation3], %s1769_s19 }
  0x39   : > { %s1775_s20 = scalar_lea.vmem (!%p1697_p8), [#allocation2], %s1939_s17 }
  0x3c   : > { %1574 = dma.done.wait (%p1684_p4), %s278_s18, 256  }
  0x3d   : > { %1576 = vsyncadd (%p1684_p4), %s278_s18, 4294967040 }
  0x3e   : > { %1578 = dma.done.wait (%p49_p1), [#allocation6], 2064  }
  0x3f   : > { %1580 = vsyncadd (%p49_p1), [#allocation6], 4294965232 }
  0x40   : > { %1582 = dma.done.wait (%p49_p1), [#allocation9], 2048  }
  0x41   : > { %1584 = vsyncadd (%p49_p1), [#allocation9], 4294965248  ;;  %v1165_v0 = vld [vmem:[#allocation7 + $0x70] sm:$0xf]  ;;  %v1268_v1 = vld [vmem:[#allocation7 + $0x74] sm:$0xf0] }
  0x42   : > { %v1267_v2 = vld [vmem:[#allocation7 + $0x74] sm:$0xf]  ;;  %v1166_v3 = vor.u32 %v1268_v1, %v1165_v0  ;;  %v1167_v4 = vld [vmem:[#allocation7 + $0x78] sm:$0xf0]  ;;  %v1157_v5 = vld [vmem:[#allocation7 + $0x60] sm:$0xf]  ;;  %v474_v0 = vlaneseq }
  0x43   : > { %v1266_v6 = vld [vmem:[#allocation7 + $0x64] sm:$0xf0]  ;;  %v1170_v7 = vor.u32 %v1267_v2, %v1167_v4  ;;  %v1265_v8 = vld [vmem:[#allocation7 + $0x64] sm:$0xf]  ;;  %v1159_v9 = vld [vmem:[#allocation7 + $0x68] sm:$0xf0] }
  0x44   : > { %438 = vmatpush.bf16.msra.mxu0 %v1166_v3  ;;  %v1158_v10 = vor.u32 %v1266_v6, %v1157_v5  ;;  %v1162_v11 = vor.u32 %v1265_v8, %v1159_v9  ;;  %v1149_v12 = vld [vmem:[#allocation7 + $0x50] sm:$0xf]  ;;  %v1264_v13 = vld [vmem:[#allocation7 + $0x54] sm:$0xf0]  ;;  %v1263_v14 = vld [vmem:[#allocation7 + $0x54] sm:$0xf] }
  0x45   : > { %452 = vmatpush.bf16.msra.mxu1 %v1170_v7  ;;  %v1151_v15 = vld [vmem:[#allocation7 + $0x58] sm:$0xf0]  ;;  %v1150_v16 = vor.u32 %v1264_v13, %v1149_v12  ;;  %v1141_v18 = vld [vmem:[#allocation7 + $0x40] sm:$0xf]  ;;  %v1262_v19 = vld [vmem:[#allocation7 + $0x44] sm:$0xf0] }
  0x46   : > { %v1154_v17 = vor.u32 %v1263_v14, %v1151_v15  ;;  %v1261_v20 = vld [vmem:[#allocation7 + $0x44] sm:$0xf]  ;;  %v1143_v21 = vld [vmem:[#allocation7 + $0x48] sm:$0xf0]  ;;  %v1142_v22 = vor.u32 %v1262_v19, %v1141_v18  ;;  %v1133_v24 = vld [vmem:[#allocation7 + $0x30] sm:$0xf] }
  0x47   : > { %v1146_v23 = vor.u32 %v1261_v20, %v1143_v21  ;;  %v1260_v25 = vld [vmem:[#allocation7 + $0x34] sm:$0xf0]  ;;  %v1259_v26 = vld [vmem:[#allocation7 + $0x34] sm:$0xf]  ;;  %v1135_v27 = vld [vmem:[#allocation7 + $0x38] sm:$0xf0] }
  0x48   : > { %439 = vmatpush.bf16.msra.mxu0 %v1158_v10  ;;  %v1134_v28 = vor.u32 %v1260_v25, %v1133_v24  ;;  %v1138_v29 = vor.u32 %v1259_v26, %v1135_v27  ;;  %v1125_v30 = vld [vmem:[#allocation7 + $0x20] sm:$0xf]  ;;  %v1258_v31 = vld [vmem:[#allocation7 + $0x24] sm:$0xf0]  ;;  %v1257_v32 = vld [vmem:[#allocation7 + $0x24] sm:$0xf] }
  0x49   : > { %453 = vmatpush.bf16.msra.mxu1 %v1162_v11  ;;  %v1127_v33 = vld [vmem:[#allocation7 + $0x28] sm:$0xf0]  ;;  %v1126_v34 = vor.u32 %v1258_v31, %v1125_v30  ;;  %v1117_v36 = vld [vmem:[#allocation7 + $0x10] sm:$0xf]  ;;  %v1256_v37 = vld [vmem:[#allocation7 + $0x14] sm:$0xf0] }
  0x4a   : > { %v1130_v35 = vor.u32 %v1257_v32, %v1127_v33  ;;  %v1255_v38 = vld [vmem:[#allocation7 + $0x14] sm:$0xf]  ;;  %v1119_v39 = vld [vmem:[#allocation7 + $0x18] sm:$0xf0]  ;;  %v1118_v41 = vor.u32 %v1256_v37, %v1117_v36  ;;  %v1109_v45 = vld [vmem:[#allocation7] sm:$0xf] }
  0x4b   : > { %v1375_v40 = vld [vmem:[#allocation5] ss:$0 sm:$0xff]  ;;  %v334_v43 = vld [vmem:[%s1775_s20 + $0x8] sm:$0xff]  ;;  %v1122_v44 = vor.u32 %v1255_v38, %v1119_v39  ;;  %v1804_v1 = vand.u32 127, %v474_v0  ;;  %s1106_s27 = sshll.u32 %s1769_s19, 1  ;;  %s1249_s11 = sshll.u32 %s1675_s25, 1 }
  0x4c   : > { %440 = vmatpush.bf16.msra.mxu0 %v1150_v16  ;;  %v333_v42 = vld [vmem:[%s1775_s20] sm:$0xff]  ;;  %v1254_v46 = vld [vmem:[#allocation7 + $0x4] sm:$0xf0]  ;;  %v340_v50 = vsub.f32 %v334_v43, %v1375_v40  ;;  %s330_s8 = scalar_lea.vmem [#allocation11], %s1106_s27  ;;  %s954_s26 = scalar_lea.hbm %s1936_s6, %s1249_s11 }
  0x4d   : > { %454 = vmatpush.bf16.msra.mxu1 %v1154_v17  ;;  %v1253_v47 = vld [vmem:[#allocation7 + $0x4] sm:$0xf]  ;;  %v1111_v48 = vld [vmem:[#allocation7 + $0x8] sm:$0xf0]  ;;  %v339_v49 = vsub.f32 %v333_v42, %v1375_v40  ;;  %v1110_v51 = vor.u32 %v1254_v46, %v1109_v45  ;;  %v1807_v2 = vadd.s32 128, %v1804_v1  ;;  %s956_s29 = sshll.u32 %s330_s8, 4  ;;  %s957_s29 = int_to_ptr.vmem [resolvable:$true] %s956_s29 }
  0x4e   : > { %v1114_v52 = vor.u32 %v1253_v47, %v1111_v48  ;;  %s958_s16 = sshll.u32 %s954_s26, 4  ;;  %s927_s7 = scalar_lea.sflag [#allocation12], %s1769_s19  ;;  %s959_s16 = int_to_ptr.hbm [resolvable:$true] %s958_s16 }
  0x4f   : > { %v341_v53 = vpack.c.bf16 %v340_v50, %v339_v49  ;;  %s1515_s18 = sshra.s32 %s959_s16, 4  ;;  %s1521_s9 = scalar_lea.hbm %s1936_s6, 4  ;;  %s1516_s18 = int_to_ptr.hbm [resolvable:$true] %s1515_s18 }
  0x50   : > { %441 = vmatpush.bf16.msra.mxu0 %v1142_v22  ;;  %s1517_s20 = scalar_lea.hbm %s1516_s18, 2  ;;  %p1522_p9 = scmp.lt.s32.totalorder %s1516_s18, %s1936_s6 }
  0x51   : > { %455 = vmatpush.bf16.msra.mxu1 %v1146_v23  ;;  %p1518_p1 = scmp.ne.s32.totalorder %s1516_s18, %s1517_s20  ;;  %p1523_p10 = scmp.lt.s32.totalorder %s1521_s9, %s1517_s20 }
  0x53   : > { %p1519_p4 = pnand %p1518_p1, %p1739_p3  ;;  %p1524_p2 = por %p1523_p10, %p1522_p9 }
  0x54   : > { %442 = vmatpush.bf16.msra.mxu0 %v1134_v28 }
  0x55   : > { %456 = vmatpush.bf16.msra.mxu1 %v1138_v29  ;;  %p1520_p8 = pneg %p1519_p4 }
  0x57   : > { %p1525_p11 = pnand %p1524_p2, %p1520_p8 }
  0x58   : > { %443 = vmatpush.bf16.msra.mxu0 %v1126_v34 }
  0x59   : > { %457 = vmatpush.bf16.msra.mxu1 %v1130_v35 }
  0x5c   : > { %444 = vmatpush.bf16.msra.mxu0 %v1118_v41 }
  0x5d   : > { %458 = vmatpush.bf16.msra.mxu1 %v1122_v44 }
  0x60   : > { %445 = vmatpush.bf16.msra.mxu0 %v1110_v51 }
  0x61   : > { %459 = vmatpush.bf16.msra.mxu1 %v1114_v52 }
  0x63   : > { %446 = vmatmul.bf16.vlgmr.msra.gmra.mxu0 %v341_v53 }
  0x64   : > { %460 = vmatmul.bf16.vlgmr.msra.gmra.mxu1 %v341_v53 }
  0xe0   : > { %v447_v54 = vpop.f32.mrf.mxu0 }
  0xe1   : > { %v1791_v55 = vclamps-f32 %v447_v54, 3e+38  ;;  %v461_v56 = vpop.f32.mrf.mxu1 }
  0xe2   : > { %v1793_v57 = vclamps-f32 %v461_v56, 3e+38 }
  0xe4   : > { %v477_v58 = vmax.f32 %v1791_v55, %v1793_v57 }
  0xe6   : > { %478 = vmax.xlane.f32.xlu0 %v477_v58 }
  0xe8   : > { %v449_v59 = vpop.f32.mrf.mxu0 }
  0xe9   : > { %v1797_v60 = vclamps-f32 %v449_v59, 3e+38  ;;  %v463_v61 = vpop.f32.mrf.mxu1 }
  0xea   : > { %v1799_v62 = vclamps-f32 %v463_v61, 3e+38 }
  0xec   : > { %v480_v63 = vmax.f32 %v1797_v60, %v1799_v62 }
  0xee   : > { %481 = vmax.xlane.f32.xlu0 %v480_v63 }
 0x159   : > { %v479_v3 = vpop.xlane.xlu0 %478 }
 0x15a   : > { %vm483_vm0 = vcmp.eq.f32.partialorder %v1791_v55, %v479_v3  ;;  %vm484_vm1 = vcmp.eq.f32.partialorder %v1793_v57, %v479_v3 }
 0x15b   : > { %v487_v4 = vsel %vm483_vm0, %v1804_v1, 256  ;;  %v488_v5 = vsel %vm484_vm1, %v1807_v2, 256 }
 0x15c   : > { %vm491_vm2 = vcmp.lt.s32.totalorder %v487_v4, %v488_v5 }
 0x15d   : > { %v492_v6 = vsel %vm491_vm2, %v487_v4, %v488_v5 }
 0x15e   : > { %v494_v7 = vshra.s32 %v492_v6, 16  ;;  %v493_v15 = vand.u32 65535, %v492_v6 }
 0x160   : > { %v496_v8 = vcvt.s32.f32 %v494_v7  ;;  %v495_v17 = vcvt.s32.f32 %v493_v15 }
 0x161   : > { %v482_v9 = vpop.xlane.xlu0 %481 }
 0x162   : > { %vm485_vm3 = vcmp.eq.f32.partialorder %v1797_v60, %v482_v9  ;;  %vm486_vm4 = vcmp.eq.f32.partialorder %v1799_v62, %v482_v9  ;;  %497 = vmin.xlane.f32.xlu1 %v496_v8 }
 0x163   : > { %v489_v10 = vsel %vm485_vm3, %v1804_v1, 256  ;;  %v490_v11 = vsel %vm486_vm4, %v1807_v2, 256 }
 0x164   : > { %vm507_vm5 = vcmp.lt.s32.totalorder %v489_v10, %v490_v11 }
 0x165   : > { %v508_v12 = vsel %vm507_vm5, %v489_v10, %v490_v11 }
 0x166   : > { %v510_v13 = vshra.s32 %v508_v12, 16  ;;  %v509_v19 = vand.u32 65535, %v508_v12 }
 0x168   : > { %v512_v14 = vcvt.s32.f32 %v510_v13  ;;  %v511_v21 = vcvt.s32.f32 %v509_v19 }
 0x16a   : > { %513 = vmin.xlane.f32.xlu1 %v512_v14 }
 0x1d5   : > { %v498_v16 = vpop.xlane.xlu1 %497 }
 0x1d6   : > { %vm499_vm6 = vcmp.eq.f32.partialorder %v496_v8, %v498_v16  ;;  %v504_v23 = vcvt.f32.s32 %v498_v16 }
 0x1d7   : > { %v500_v18 = vsel %vm499_vm6, %v495_v17, inf }
 0x1d8   : > { %501 = vmin.xlane.f32.xlu2 %v500_v18  ;;  %v505_v25 = vshll.u32 %v504_v23, 16 }
 0x1dd   : > { %v514_v20 = vpop.xlane.xlu1 %513 }
 0x1de   : > { %vm515_vm7 = vcmp.eq.f32.partialorder %v512_v14, %v514_v20  ;;  %v520_v28 = vcvt.f32.s32 %v514_v20 }
 0x1df   : > { %v516_v22 = vsel %vm515_vm7, %v511_v21, inf }
 0x1e0   : > { %517 = vmin.xlane.f32.xlu2 %v516_v22  ;;  %v521_v33 = vshll.u32 %v520_v28, 16 }
 0x24b   : > { %v502_v24 = vpop.xlane.xlu2 %501 }
 0x24c   : > { %v503_v26 = vcvt.f32.s32 %v502_v24 }
 0x24e   : > { %v506_v27 = vadd.s32 %v505_v25, %v503_v26 }
 0x250   : > { %vm523_vm8 = vcmp.eq.s32.totalorder %v1804_v1, %v506_v27  ;;  %vm524_vm9 = vcmp.eq.s32.totalorder %v1807_v2, %v506_v27 }
 0x251   : > { %v527_v29 = vsel %vm523_vm8, -inf, %v1791_v55  ;;  %v528_v30 = vsel %vm524_vm9, -inf, %v1793_v57 }
 0x252   : > { %v531_v31 = vmax.f32 %v527_v29, %v528_v30 }
 0x253   : > { %v518_v32 = vpop.xlane.xlu2 %517 }
 0x254   : > { %v519_v34 = vcvt.f32.s32 %v518_v32  ;;  %532 = vmax.xlane.f32.xlu0 %v531_v31 }
 0x256   : > { %v522_v35 = vadd.s32 %v521_v33, %v519_v34 }
 0x258   : > { %vm525_vm10 = vcmp.eq.s32.totalorder %v1804_v1, %v522_v35  ;;  %vm526_vm11 = vcmp.eq.s32.totalorder %v1807_v2, %v522_v35 }
 0x259   : > { %v529_v36 = vsel %vm525_vm10, -inf, %v1797_v60  ;;  %v530_v37 = vsel %vm526_vm11, -inf, %v1799_v62 }
 0x25a   : > { %v534_v38 = vmax.f32 %v529_v36, %v530_v37 }
 0x25c   : > { %535 = vmax.xlane.f32.xlu1 %v534_v38 }
 0x2c7   : > { %v533_v39 = vpop.xlane.xlu0 %532 }
 0x2c8   : > { %vm537_vm12 = vcmp.eq.f32.partialorder %v527_v29, %v533_v39  ;;  %vm538_vm13 = vcmp.eq.f32.partialorder %v528_v30, %v533_v39 }
 0x2c9   : > { %v541_v40 = vsel %vm537_vm12, %v1804_v1, 256  ;;  %v542_v41 = vsel %vm538_vm13, %v1807_v2, 256 }
 0x2ca   : > { %vm545_vm14 = vcmp.lt.s32.totalorder %v541_v40, %v542_v41 }
 0x2cb   : > { %v546_v42 = vsel %vm545_vm14, %v541_v40, %v542_v41 }
 0x2cc   : > { %v548_v43 = vshra.s32 %v546_v42, 16  ;;  %v547_v51 = vand.u32 65535, %v546_v42 }
 0x2ce   : > { %v550_v44 = vcvt.s32.f32 %v548_v43  ;;  %v549_v53 = vcvt.s32.f32 %v547_v51 }
 0x2cf   : > { %v536_v45 = vpop.xlane.xlu1 %535 }
 0x2d0   : > { %vm539_vm15 = vcmp.eq.f32.partialorder %v529_v36, %v536_v45  ;;  %vm540_vm0 = vcmp.eq.f32.partialorder %v530_v37, %v536_v45  ;;  %551 = vmin.xlane.f32.xlu2 %v550_v44 }
 0x2d1   : > { %v543_v46 = vsel %vm539_vm15, %v1804_v1, 256  ;;  %v544_v47 = vsel %vm540_vm0, %v1807_v2, 256 }
 0x2d2   : > { %vm561_vm1 = vcmp.lt.s32.totalorder %v543_v46, %v544_v47 }
 0x2d3   : > { %v562_v48 = vsel %vm561_vm1, %v543_v46, %v544_v47 }
 0x2d4   : > { %v564_v49 = vshra.s32 %v562_v48, 16  ;;  %v563_v56 = vand.u32 65535, %v562_v48 }
 0x2d6   : > { %v566_v50 = vcvt.s32.f32 %v564_v49  ;;  %v565_v59 = vcvt.s32.f32 %v563_v56 }
 0x2d8   : > { %567 = vmin.xlane.f32.xlu0 %v566_v50 }
 0x343   : > { %v552_v52 = vpop.xlane.xlu2 %551 }
 0x344   : > { %vm553_vm2 = vcmp.eq.f32.partialorder %v550_v44, %v552_v52  ;;  %v558_v63 = vcvt.f32.s32 %v552_v52 }
 0x345   : > { %v554_v54 = vsel %vm553_vm2, %v549_v53, inf }
 0x346   : > { %555 = vmin.xlane.f32.xlu1 %v554_v54  ;;  %v559_v4 = vshll.u32 %v558_v63, 16 }
 0x34b   : > { %v568_v58 = vpop.xlane.xlu0 %567 }
 0x34c   : > { %vm569_vm3 = vcmp.eq.f32.partialorder %v566_v50, %v568_v58  ;;  %v574_v7 = vcvt.f32.s32 %v568_v58 }
 0x34d   : > { %v570_v61 = vsel %vm569_vm3, %v565_v59, inf }
 0x34e   : > { %571 = vmin.xlane.f32.xlu2 %v570_v61  ;;  %v575_v12 = vshll.u32 %v574_v7, 16 }
 0x3b9   : > { %v556_v3 = vpop.xlane.xlu1 %555 }
 0x3ba   : > { %v557_v5 = vcvt.f32.s32 %v556_v3 }
 0x3bc   : > { %v560_v6 = vadd.s32 %v559_v4, %v557_v5 }
 0x3be   : > { %vm577_vm4 = vcmp.eq.s32.totalorder %v1804_v1, %v560_v6  ;;  %vm578_vm5 = vcmp.eq.s32.totalorder %v1807_v2, %v560_v6 }
 0x3bf   : > { %v581_v8 = vsel %vm577_vm4, -inf, %v527_v29  ;;  %v582_v9 = vsel %vm578_vm5, -inf, %v528_v30 }
 0x3c0   : > { %v585_v10 = vmax.f32 %v581_v8, %v582_v9 }
 0x3c1   : > { %v572_v11 = vpop.xlane.xlu2 %571 }
 0x3c2   : > { %v573_v13 = vcvt.f32.s32 %v572_v11  ;;  %586 = vmax.xlane.f32.xlu0 %v585_v10  ;;  %v1284_v10 = vld [vmem:[#allocation8 + $0x78] sm:$0xff]  ;;  %v1275_v11 = vld [vmem:[#allocation8 + $0x30] sm:$0xff] }
 0x3c3   : > { %875 = vmatpush.bf16.msra.mxu3 %v1284_v10 }
 0x3c4   : > { %v576_v14 = vadd.s32 %v575_v12, %v573_v13  ;;  %v1283_v12 = vld [vmem:[#allocation8 + $0x70] sm:$0xff]  ;;  %v1274_v13 = vld [vmem:[#allocation8 + $0x28] sm:$0xff] }
 0x3c6   : > { %vm579_vm6 = vcmp.eq.s32.totalorder %v1804_v1, %v576_v14  ;;  %vm580_vm7 = vcmp.eq.s32.totalorder %v1807_v2, %v576_v14  ;;  %v1282_v14 = vld [vmem:[#allocation8 + $0x68] sm:$0xff] }
 0x3c7   : > { %v583_v15 = vsel %vm579_vm6, -inf, %v529_v36  ;;  %v584_v16 = vsel %vm580_vm7, -inf, %v530_v37  ;;  %876 = vmatpush.bf16.msra.mxu3 %v1283_v12 }
 0x3c8   : > { %v588_v17 = vmax.f32 %v583_v15, %v584_v16 }
 0x3ca   : > { %589 = vmax.xlane.f32.xlu1 %v588_v17 }
 0x3cb   : > { %877 = vmatpush.bf16.msra.mxu3 %v1282_v14 }
 0x435   : > { %v587_v18 = vpop.xlane.xlu0 %586 }
 0x436   : > { %vm591_vm8 = vcmp.eq.f32.partialorder %v581_v8, %v587_v18  ;;  %vm592_vm9 = vcmp.eq.f32.partialorder %v582_v9, %v587_v18 }
 0x437   : > { %v595_v19 = vsel %vm591_vm8, %v1804_v1, 256  ;;  %v596_v20 = vsel %vm592_vm9, %v1807_v2, 256 }
 0x438   : > { %vm599_vm10 = vcmp.lt.s32.totalorder %v595_v19, %v596_v20 }
 0x439   : > { %v600_v21 = vsel %vm599_vm10, %v595_v19, %v596_v20 }
 0x43a   : > { %v602_v22 = vshra.s32 %v600_v21, 16  ;;  %v601_v30 = vand.u32 65535, %v600_v21 }
 0x43c   : > { %v604_v23 = vcvt.s32.f32 %v602_v22  ;;  %v603_v32 = vcvt.s32.f32 %v601_v30  ;;  %v1278_v30 = vld [vmem:[#allocation8 + $0x48] sm:$0xff] }
 0x43d   : > { %v590_v24 = vpop.xlane.xlu1 %589 }
 0x43e   : > { %vm593_vm11 = vcmp.eq.f32.partialorder %v583_v15, %v590_v24  ;;  %vm594_vm12 = vcmp.eq.f32.partialorder %v584_v16, %v590_v24  ;;  %605 = vmin.xlane.f32.xlu2 %v604_v23 }
 0x43f   : > { %v597_v25 = vsel %vm593_vm11, %v1804_v1, 256  ;;  %v598_v26 = vsel %vm594_vm12, %v1807_v2, 256 }
 0x440   : > { %vm615_vm13 = vcmp.lt.s32.totalorder %v597_v25, %v598_v26 }
 0x441   : > { %v616_v27 = vsel %vm615_vm13, %v597_v25, %v598_v26  ;;  %v1272_v25 = vld [vmem:[#allocation8 + $0x18] sm:$0xff] }
 0x442   : > { %v618_v28 = vshra.s32 %v616_v27, 16  ;;  %v617_v34 = vand.u32 65535, %v616_v27  ;;  %v1280_v26 = vld [vmem:[#allocation8 + $0x58] sm:$0xff]  ;;  %v1271_v27 = vld [vmem:[#allocation8 + $0x10] sm:$0xff] }
 0x444   : > { %v620_v29 = vcvt.s32.f32 %v618_v28  ;;  %v619_v36 = vcvt.s32.f32 %v617_v34  ;;  %v1279_v28 = vld [vmem:[#allocation8 + $0x50] sm:$0xff] }
 0x446   : > { %621 = vmin.xlane.f32.xlu0 %v620_v29 }
 0x4b1   : > { %v606_v31 = vpop.xlane.xlu2 %605 }
 0x4b2   : > { %vm607_vm14 = vcmp.eq.f32.partialorder %v604_v23, %v606_v31  ;;  %v612_v38 = vcvt.f32.s32 %v606_v31  ;;  %v1269_v31 = vld [vmem:[#allocation8] sm:$0xff] }
 0x4b3   : > { %v608_v33 = vsel %vm607_vm14, %v603_v32, inf  ;;  %v1277_v32 = vld [vmem:[#allocation8 + $0x40] sm:$0xff] }
 0x4b4   : > { %609 = vmin.xlane.f32.xlu1 %v608_v33  ;;  %v613_v40 = vshll.u32 %v612_v38, 16 }
 0x4b9   : > { %v622_v35 = vpop.xlane.xlu0 %621 }
 0x4ba   : > { %vm623_vm15 = vcmp.eq.f32.partialorder %v620_v29, %v622_v35  ;;  %v628_v43 = vcvt.f32.s32 %v622_v35  ;;  %v1270_v29 = vld [vmem:[#allocation8 + $0x8] sm:$0xff] }
 0x4bb   : > { %v624_v37 = vsel %vm623_vm15, %v619_v36, inf }
 0x4bc   : > { %625 = vmin.xlane.f32.xlu2 %v624_v37  ;;  %v629_v48 = vshll.u32 %v628_v43, 16 }
 0x527   : > { %v610_v39 = vpop.xlane.xlu1 %609 }
 0x528   : > { %v611_v41 = vcvt.f32.s32 %v610_v39 }
 0x52a   : > { %v614_v42 = vadd.s32 %v613_v40, %v611_v41 }
 0x52c   : > { %vm631_vm0 = vcmp.eq.s32.totalorder %v1804_v1, %v614_v42  ;;  %vm632_vm1 = vcmp.eq.s32.totalorder %v1807_v2, %v614_v42 }
 0x52d   : > { %v1839_v44 = vsel %vm631_vm0, -inf, %v581_v8  ;;  %v1841_v45 = vsel %vm632_vm1, -inf, %v582_v9  ;;  %v1276_v9 = vld [vmem:[#allocation8 + $0x38] sm:$0xff] }
 0x52e   : > { %v639_v46 = vmax.f32 %v1839_v44, %v1841_v45  ;;  %861 = vmatpush.bf16.msra.mxu2 %v1276_v9 }
 0x52f   : > { %v626_v47 = vpop.xlane.xlu2 %625 }
 0x530   : > { %v627_v49 = vcvt.f32.s32 %v626_v47  ;;  %640 = vmax.xlane.f32.xlu0 %v639_v46 }
 0x532   : > { %v630_v50 = vadd.s32 %v629_v48, %v627_v49  ;;  %862 = vmatpush.bf16.msra.mxu2 %v1275_v11  ;;  %v1240_v49 = vpack.c.bf16 %v1797_v60, %v1791_v55 }
 0x534   : > { %vm633_vm2 = vcmp.eq.s32.totalorder %v1804_v1, %v630_v50  ;;  %vm634_vm3 = vcmp.eq.s32.totalorder %v1807_v2, %v630_v50 }
 0x535   : > { %v1847_v51 = vsel %vm633_vm2, -inf, %v583_v15  ;;  %v1849_v52 = vsel %vm634_vm3, -inf, %v584_v16  ;;  %v1273_v15 = vld [vmem:[#allocation8 + $0x20] sm:$0xff] }
 0x536   : > { %v642_v53 = vmax.f32 %v1847_v51, %v1849_v52  ;;  %863 = vmatpush.bf16.msra.mxu2 %v1274_v13  ;;  %v1281_v16 = vld [vmem:[#allocation8 + $0x60] sm:$0xff] }
 0x537   : > { %878 = vmatpush.bf16.msra.mxu3 %v1281_v16 }
 0x538   : > { %643 = vmax.xlane.f32.xlu1 %v642_v53 }
 0x53a   : > { %864 = vmatpush.bf16.msra.mxu2 %v1273_v15 }
 0x53b   : > { %879 = vmatpush.bf16.msra.mxu3 %v1280_v26 }
 0x53e   : > { %865 = vmatpush.bf16.msra.mxu2 %v1272_v25 }
 0x53f   : > { %880 = vmatpush.bf16.msra.mxu3 %v1279_v28 }
 0x542   : > { %866 = vmatpush.bf16.msra.mxu2 %v1271_v27 }
 0x543   : > { %881 = vmatpush.bf16.msra.mxu3 %v1278_v30 }
 0x546   : > { %867 = vmatpush.bf16.msra.mxu2 %v1270_v29 }
 0x547   : > { %882 = vmatpush.bf16.msra.mxu3 %v1277_v32 }
 0x54a   : > { %868 = vmatpush.bf16.msra.mxu2 %v1269_v31 }
 0x5a3   : > { %v641_v54 = vpop.xlane.xlu0 %640 }
 0x5a4   : > { %vm645_vm4 = vcmp.eq.f32.partialorder %v1839_v44, %v641_v54  ;;  %vm646_vm5 = vcmp.eq.f32.partialorder %v1841_v45, %v641_v54 }
 0x5a5   : > { %v649_v56 = vsel %vm645_vm4, %v1804_v1, 256  ;;  %v650_v58 = vsel %vm646_vm5, %v1807_v2, 256 }
 0x5a6   : > { %vm653_vm6 = vcmp.lt.s32.totalorder %v649_v56, %v650_v58 }
 0x5a7   : > { %v654_v59 = vsel %vm653_vm6, %v649_v56, %v650_v58  ;;  %vm716_vm6 = vcmask 1040384  }
 0x5a8   : > { %v656_v61 = vshra.s32 %v654_v59, 16  ;;  %v655_v17 = vand.u32 65535, %v654_v59 }
 0x5aa   : > { %v658_v63 = vcvt.s32.f32 %v656_v61  ;;  %v657_v19 = vcvt.s32.f32 %v655_v17 }
 0x5ab   : > { %v644_v3 = vpop.xlane.xlu1 %643 }
 0x5ac   : > { %vm647_vm7 = vcmp.eq.f32.partialorder %v1847_v51, %v644_v3  ;;  %vm648_vm8 = vcmp.eq.f32.partialorder %v1849_v52, %v644_v3  ;;  %659 = vmin.xlane.f32.xlu2 %v658_v63 }
 0x5ad   : > { %v651_v4 = vsel %vm647_vm7, %v1804_v1, 256  ;;  %v652_v5 = vsel %vm648_vm8, %v1807_v2, 256  ;;  %vm720_vm7 = vcmp.lt.s32.totalorder %v474_v0, 256 }
 0x5ae   : > { %vm669_vm9 = vcmp.lt.s32.totalorder %v651_v4, %v652_v5 }
 0x5af   : > { %v670_v6 = vsel %vm669_vm9, %v651_v4, %v652_v5 }
 0x5b0   : > { %v672_v7 = vshra.s32 %v670_v6, 16  ;;  %v671_v21 = vand.u32 65535, %v670_v6 }
 0x5b2   : > { %v674_v8 = vcvt.s32.f32 %v672_v7  ;;  %v673_v23 = vcvt.s32.f32 %v671_v21  ;;  %v1376_v7 = vld [vmem:[%s1934_s4] ss:$0 sm:$0xff] }
 0x5b4   : > { %675 = vmin.xlane.f32.xlu0 %v674_v8 }
 0x61f   : > { %v660_v18 = vpop.xlane.xlu2 %659 }
 0x620   : > { %vm661_vm10 = vcmp.eq.f32.partialorder %v658_v63, %v660_v18  ;;  %v666_v33 = vcvt.f32.s32 %v660_v18 }
 0x621   : > { %v662_v20 = vsel %vm661_vm10, %v657_v19, inf }
 0x622   : > { %663 = vmin.xlane.f32.xlu1 %v662_v20  ;;  %v667_v35 = vshll.u32 %v666_v33, 16 }
 0x627   : > { %v676_v22 = vpop.xlane.xlu0 %675 }
 0x628   : > { %vm677_vm11 = vcmp.eq.f32.partialorder %v674_v8, %v676_v22  ;;  %v682_v38 = vcvt.f32.s32 %v676_v22 }
 0x629   : > { %v678_v24 = vsel %vm677_vm11, %v673_v23, inf }
 0x62a   : > { %679 = vmin.xlane.f32.xlu2 %v678_v24  ;;  %v683_v40 = vshll.u32 %v682_v38, 16 }
 0x695   : > { %v664_v34 = vpop.xlane.xlu1 %663 }
 0x696   : > { %v665_v36 = vcvt.f32.s32 %v664_v34 }
 0x698   : > { %v668_v37 = vadd.s32 %v667_v35, %v665_v36 }
 0x69a   : > { %vm685_vm12 = vcmp.eq.s32.totalorder %v1804_v1, %v668_v37  ;;  %vm686_vm13 = vcmp.eq.s32.totalorder %v1807_v2, %v668_v37 }
 0x69b   : > { %v689_v42 = vsel %vm685_vm12, -inf, %v1839_v44  ;;  %v690_v43 = vsel %vm686_vm13, -inf, %v1841_v45  ;;  %v1243_v44 = vpack.c.bf16 %v1799_v62, %v1793_v57  ;;  %v1616_v45 = vmov 0  }
 0x69c   : > { %vm693_vm0 = vcmp.eq.f32.partialorder %v689_v42, -inf  ;;  %vm694_vm1 = vcmp.eq.f32.partialorder %v690_v43, -inf }
 0x69d   : > { %v680_v39 = vpop.xlane.xlu2 %679  ;;  %v697_v50 = vsel %vm693_vm0, 1, %v1616_v45 }
 0x69e   : > { %v681_v41 = vcvt.f32.s32 %v680_v39 }
 0x6a0   : > { %v684_v46 = vadd.s32 %v683_v40, %v681_v41 }
 0x6a2   : > { %vm687_vm14 = vcmp.eq.s32.totalorder %v1804_v1, %v684_v46  ;;  %vm688_vm15 = vcmp.eq.s32.totalorder %v1807_v2, %v684_v46  ;;  %v698_v1 = vsel %vm694_vm1, 1, %v1616_v45 }
 0x6a3   : > { %v691_v47 = vsel %vm687_vm14, -inf, %v1847_v51  ;;  %v692_v48 = vsel %vm688_vm15, -inf, %v1849_v52 }
 0x6a4   : > { %vm695_vm2 = vcmp.eq.f32.partialorder %v691_v47, -inf  ;;  %vm696_vm3 = vcmp.eq.f32.partialorder %v692_v48, -inf }
 0x6a5   : > { %v699_v53 = vsel %vm695_vm2, 1, %v1616_v45  ;;  %vm1239_vm4 = vmpackc.low %vm695_vm2, %vm693_vm0  ;;  %v700_v2 = vsel %vm696_vm3, 1, %v1616_v45 }
 0x6a6   : > { %v701_v54 = vadd.s32 %v699_v53, %v697_v50  ;;  %1241 = vmatmul.msk.bf16.vlgmr.msra.gmra.mxu2 %vm1239_vm4, %v1240_v49  ;;  %v708_v51 = vadd.s32 %v700_v2, %v698_v1  ;;  %vm1242_vm5 = vmpackc.low %vm696_vm3, %vm694_vm1 }
 0x6a7   : > { %1244 = vmatmul.msk.bf16.vlgmr.msra.gmra.mxu3 %vm1242_vm5, %v1243_v44 }
 0x6a8   : > { %v702_v52 = vrot.slane %v701_v54, 4  ;;  %v709_v55 = vrot.slane %v708_v51, 4 }
 0x6aa   : > { %v703_v60 = vadd.s32 %v702_v52, %v701_v54  ;;  %v710_v56 = vadd.s32 %v709_v55, %v708_v51 }
 0x6ac   : > { %v704_v58 = vrot.slane %v703_v60, 2  ;;  %v711_v57 = vrot.slane %v710_v56, 2 }
 0x6ae   : > { %v705_v62 = vadd.s32 %v704_v58, %v703_v60  ;;  %v712_v59 = vadd.s32 %v711_v57, %v710_v56 }
 0x6b0   : > { %v706_v61 = vrot.slane %v705_v62, 1  ;;  %v713_v63 = vrot.slane %v712_v59, 1 }
 0x6b2   : > { %v714_v3 = vadd.s32 %v713_v63, %v712_v59  ;;  %v707_v4 = vadd.s32 %v706_v61, %v705_v62 }
 0x6b4   : > { %v715_v5 = vrot.slane %v714_v3, 7 }
 0x6b6   : > { %v717_v6 = vsel %vm716_vm6, %v707_v4, %v715_v5 }
 0x6b7   : > { %722 = vst.msk [vmem:[%s330_s8] sm:$0x3] %vm720_vm7, %v717_v6 }
 0x729   : > { %v870_v8 = vpop.f32.mrf.mxu2 }
 0x72a   : > { %v871_v9 = vadd.f32 %v1376_v7, %v870_v8  ;;  %v884_v10 = vpop.f32.mrf.mxu3 }
 0x72c   : > { %v885_v11 = vadd.f32 %v884_v10, %v871_v9 }
 0x72e   : > { %v889_v12 = vmul.f32 %v885_v11, %v885_v11 }
 0x730   : > { %891 = vadd.xlane.f32.xlu0 %v889_v12 }
 0x731   : > { %v872_v13 = vpop.f32.mrf.mxu2 }
 0x732   : > { %v873_v14 = vadd.f32 %v1376_v7, %v872_v13  ;;  %v886_v15 = vpop.f32.mrf.mxu3 }
 0x734   : > { %v887_v0 = vadd.f32 %v886_v15, %v873_v14 }
 0x736   : > { %v890_v16 = vmul.f32 %v887_v0, %v887_v0 }
 0x738   : > { %893 = vadd.xlane.f32.xlu1 %v890_v16 }
 0x739   : > { %1528 = shalt.err (!%p1525_p11)
}
 0x73a   : > { %1301 = dma.vmem_to_hbm [thread:$0]  (%p1739_p3), %s957_s29, 32, %s959_s16, %s927_s7  }
 0x73b   : > { %s1285_s0 = sshll.u32 %s1675_s25, 4  ;;  %s1950_s12 = sshll.u32 %s1769_s19, 4 }
 0x73c   : > { %s938_s11 = scalar_lea.hbm %s1935_s5, %s1285_s0  ;;  %s323_s14 = scalar_lea.vmem [#allocation10], %s1950_s12 }
 0x73d   : > { %s939_s26 = sshll.u32 %s323_s14, 4  ;;  %s941_s29 = sshll.u32 %s938_s11, 4  ;;  %s940_s26 = int_to_ptr.vmem [resolvable:$true] %s939_s26  ;;  %s942_s29 = int_to_ptr.hbm [resolvable:$true] %s941_s29 }
 0x73e   : > { %s922_s25 = scalar_lea.sflag [#allocation4], %s1769_s19  ;;  %s1543_s16 = sshra.s32 %s942_s29, 4  ;;  %s1544_s16 = int_to_ptr.hbm [resolvable:$true] %s1543_s16 }
 0x73f   : > { %s1545_s7 = scalar_lea.hbm %s1544_s16, 16  ;;  %s1549_s27 = scalar_lea.hbm %s1935_s5, 32 }
 0x740   : > { %p1546_p12 = scmp.ne.s32.totalorder %s1544_s16, %s1545_s7  ;;  %p1550_p5 = scmp.lt.s32.totalorder %s1544_s16, %s1935_s5 }
 0x741   : > { %p1551_p7 = scmp.lt.s32.totalorder %s1549_s27, %s1545_s7 }
 0x742   : > { %p1547_p13 = pnand %p1546_p12, %p1739_p3 }
 0x743   : > { %p1552_p1 = por %p1551_p7, %p1550_p5 }
 0x744   : > { %p1548_p0 = pneg %p1547_p13 }
 0x746   : > { %p1553_p4 = pnand %p1552_p1, %p1548_p0 }
 0x7a3   : > { %v892_v17 = vpop.xlane.xlu0 %891 }
 0x7a4   : > { %v895_v18 = vmax.f32 %v892_v17, 1e-24 }
 0x7a6   : > { %1377 = vrsqrt.f32 %v895_v18  ;;  %vm903_vm9 = vweird.f32 %v895_v18 }
 0x7ab   : > { %v894_v19 = vpop.xlane.xlu1 %893 }
 0x7ac   : > { %v1378_v20 = vpop.eup %1377  ;;  %v896_v21 = vmax.f32 %v894_v19, 1e-24 }
 0x7ad   : > { %v898_v22 = vmul.f32 %v1378_v20, %v895_v18  ;;  %vm904_vm8 = vweird.f32 %v1378_v20 }
 0x7ae   : > { %1379 = vrsqrt.f32 %v896_v21  ;;  %vm905_vm10 = vmor %vm903_vm9, %vm904_vm8  ;;  %vm913_vm12 = vweird.f32 %v896_v21 }
 0x7af   : > { %v899_v23 = vmul.f32 %v1378_v20, %v898_v22 }
 0x7b1   : > { %v900_v24 = vmul.f32 0.5, %v899_v23 }
 0x7b3   : > { %v901_v25 = vsub.f32 1.5, %v900_v24 }
 0x7b4   : > { %v1380_v26 = vpop.eup %1379 }
 0x7b5   : > { %v902_v27 = vmul.f32 %v1378_v20, %v901_v25  ;;  %v908_v28 = vmul.f32 %v1380_v26, %v896_v21  ;;  %vm914_vm11 = vweird.f32 %v1380_v26 }
 0x7b6   : > { %vm915_vm13 = vmor %vm913_vm12, %vm914_vm11 }
 0x7b7   : > { %v906_v29 = vsel %vm905_vm10, %v1378_v20, %v902_v27  ;;  %v909_v30 = vmul.f32 %v1380_v26, %v908_v28 }
 0x7b8   : > { %v917_v31 = vmul.f32 %v906_v29, %v885_v11 }
 0x7b9   : > { %v910_v32 = vmul.f32 0.5, %v909_v30 }
 0x7ba   : > { %919 = vst [vmem:[%s323_s14] sm:$0xff] %v917_v31 }
 0x7bb   : > { %v911_v33 = vsub.f32 1.5, %v910_v32 }
 0x7bd   : > { %v912_v34 = vmul.f32 %v1380_v26, %v911_v33 }
 0x7bf   : > { %v916_v35 = vsel %vm915_vm13, %v1380_v26, %v912_v34 }
 0x7c0   : > { %v918_v36 = vmul.f32 %v916_v35, %v887_v0 }
 0x7c2   : > { %920 = vst [vmem:[%s323_s14 + $0x8] sm:$0xff] %v918_v36 }
 0x7c3   : > { %1556 = shalt.err (!%p1553_p4)
}
 0x7c4   : > { %s1617_s19 = smov 128   ;;  %s1618_s0 = smov 8  }
 0x7c5   : > { %1300 = dma.vmem_to_hbm [thread:$0]  (%p1739_p3), %s940_s26, 256, %s942_s29, %s922_s25, %s1617_s19, %s1617_s19, %s1618_s0  }
 0x7c6 PF: > { %s970_s17 = sand.u32 1, %s1595_s21   ;;  %p1951_p8 = scmp.ge.s32.totalorder %s1607_s24, 2 }
 0x7c7   : > { %s971_s8 = scalar_lea.sflag [#allocation4], %s970_s17 }
 0x7c8   : > { %p1319_p9 = pnand %p1951_p8, %p1689_p6 }
 0x7ca   : > { %p1320_p10 = pneg %p1319_p9 }
 0x7cc   : > { %1586 = dma.done.wait (%p1320_p10), %s971_s8, 256  }
 0x7cd   : > { %1588 = vsyncadd (%p1320_p10), %s971_s8, 4294967040  ;;  %s981_s11 = scalar_lea.sflag [#allocation12], %s970_s17 }
 0x7ce   : > { %1590 = dma.done.wait (%p1320_p10), %s981_s11, 32  }
 0x7cf   : > { %1592 = vsyncadd (%p1320_p10), %s981_s11, 4294967264  ;;  %p25_p3 = scmp.ge.s32.totalorder %s1726_s10, 4   ;;  %s1952_s21 = smov %s1599_s22 }
 0x7d0   : > { %s1953_s22 = smov %s1603_s23  ;;  %s1954_s23 = smov %s1735_s13 }
 0x7d1   : > { %s1955_s24 = smov %s1726_s10  ;;  %27 = sbr.rel (!%p25_p3) target bundleno = 11 (0xb), region = 114 }
 0x7d6   :  { %987 = vsyncpa [#allocation3], 1 }
 0x7d7   :  { %989 = vsyncpa [#allocation3 + $0x1], 1 }
 0x7d8   :  { %990 = vsyncpa [#allocation6], 1 }
 0x7d9   :  { %991 = vsyncpa [#allocation9], 1 }
 0x7da   :  { %992 = vsyncpa [#allocation4], 1 }
 0x7db   :  { %994 = vsyncpa [#allocation4 + $0x1], 1 }
 0x7dc   :  { %995 = vsyncpa [#allocation12], 1 }
 0x7dd   :  { %997 = vsyncpa [#allocation12 + $0x1], 1 }

// kernel: tpu_custom_call.1
= control target key start
LH: loop header
LB: loop body
LE: loop exit
PB: predicated region body
PF: predicated region fallthrough
CT: control target
= control target key end

     0   :  { %s1930_s0 = inlined_call_operand.hbm [shape: f32[32,128], index: 0, kind: input, shape index: {}]   ;;  %s1931_s1 = inlined_call_operand.hbm [shape: f32[1,128], index: 1, kind: input, shape index: {}]   ;;  %s1932_s2 = inlined_call_operand.hbm [shape: bf16[128,256], index: 2, kind: input, shape index: {}]   ;;  %s1933_s3 = inlined_call_operand.hbm [shape: bf16[256,128], index: 3, kind: input, shape index: {}]   ;;  %s1934_s4 = inlined_call_operand.vmem [shape: f32[1,128], index: 4, kind: input, shape index: {}]   ;;  %s1935_s5 = inlined_call_operand.hbm [shape: f32[32,128], index: 5, kind: output, shape index: {0}]   ;;  %s1936_s6 = inlined_call_operand.hbm [shape: s32[2,1,256], index: 6, kind: output, shape index: {1}]  }
   0x1   :  { %1940 = sst [smem:[#allocation18_spill]] %s1930_s0 }
   0x2   :  { %12 = vsyncpa [#allocation3], 0 }
   0x3   :  { %14 = vsyncpa [#allocation3 + $0x1], 0 }
   0x4   :  { %15 = vsyncpa [#allocation6], 0 }
   0x5   :  { %16 = vsyncpa [#allocation9], 0 }
   0x6   :  { %17 = vsyncpa [#allocation4], 0 }
   0x7   :  { %19 = vsyncpa [#allocation4 + $0x1], 0 }
   0x8   :  { %20 = vsyncpa [#allocation12], 0 }
   0x9   :  { %22 = vsyncpa [#allocation12 + $0x1], 0  ;;  %s1654_s21 = smov 0   ;;  %s1656_s22 = smov 0  }
   0xa   :  { %s1658_s23 = smov 0   ;;  %s1660_s24 = smov 0  }
   0xb LB: > { %s1675_s25 = sadd.s32 4294967295, %s1607_s24   ;;  %s1091_s26 = sadd.s32 4294967294, %s1607_s24   ;;  %s1607_s24 = sphi %s1660_s24, %s1955_s24   ;;  %s1603_s23 = sphi %s1658_s23, %s1954_s23   ;;  %s1599_s22 = sphi %s1656_s22, %s1953_s22   ;;  %s1595_s21 = sphi %s1654_s21, %s1952_s21  }
   0xc   : > { %p48_p0 = scmp.ne.s32.totalorder %s1599_s22, %s1595_s21  ;;  %p49_p1 = scmp.eq.s32.totalorder %s1675_s25, 0 }
   0xd   : > { %p156_p2 = scmp.eq.s32.totalorder %s1675_s25, 1  ;;  %p162_p3 = scmp.eq.s32.totalorder %s1091_s26, 1 }
   0xe   : > { %p1684_p4 = por %p49_p1, %p48_p0  ;;  %p1092_p5 = scmp.ge.s32.totalorder %s1607_s24, 1 }
   0xf   : > { %p1689_p6 = por %p162_p3, %p48_p0  ;;  %p195_p7 = scmp.lt.s32.totalorder %s1607_s24, 3 }
  0x10   : > { %s207_s7 = sshll.u32 %s1931_s1, 4  ;;  %s1609_s9 = smov [#allocation5]   ;;  %s208_s7 = int_to_ptr.hbm [resolvable:$true] %s207_s7 }
  0x11   : > { %p1697_p8 = pnand %p1092_p5, %p195_p7  ;;  %s209_s10 = sshll.u32 %s1609_s9, 4  ;;  %s210_s10 = int_to_ptr.vmem [resolvable:$true] %s209_s10 }
  0x12   : > { %s218_s13 = sshll.u32 %s1932_s2, 4  ;;  %s1610_s15 = smov [#allocation7]   ;;  %s219_s13 = int_to_ptr.hbm [resolvable:$true] %s218_s13 }
  0x13   : > { %p1304_p10 = pneg %p1697_p8  ;;  %s220_s16 = sshll.u32 %s1610_s15, 4  ;;  %s221_s16 = int_to_ptr.vmem [resolvable:$true] %s220_s16 }
  0x14   : > { %s1937_s17 = smov 128   ;;  %s1938_s18 = smov 8  }
  0x15   : > { %p1709_p11 = pnand %p1304_p10, %p49_p1  ;;  %s232_s26 = sshll.u32 %s1933_s3, 4  ;;  %s233_s26 = int_to_ptr.hbm [resolvable:$true] %s232_s26 }
  0x16   : > { %s1613_s29 = smov [#allocation8]   ;;  %s1615_s9 = smov 4  }
  0x17   : > { %1307 = dma.hbm_to_vmem [thread:$0]  (!%p1709_p11), %s208_s7, 16, %s210_s10, [#allocation6]  }
  0x18   : > { %1310 = dma.hbm_to_vmem [thread:$0]  (!%p1709_p11), %s219_s13, 2048, %s221_s16, [#allocation6], %s1937_s17, %s1937_s17, %s1938_s18  }
  0x19   : > { %s234_s30 = sshll.u32 %s1613_s29, 4  ;;  %s1614_s7 = smov 64   ;;  %s235_s30 = int_to_ptr.vmem [resolvable:$true] %s234_s30 }
  0x1a   : > { %1313 = dma.hbm_to_vmem [thread:$0]  (!%p1709_p11), %s233_s26, 2048, %s235_s30, [#allocation9], %s1614_s7, %s1614_s7, %s1615_s9  }
  0x1b   : > { %s1726_s10 = sadd.s32 1, %s1607_s24   ;;  %s35_s12 = sadd.s32 1, %s1603_s23 }
  0x1c   : > { %s32_s11 = ssub.s32 %s1607_s24, %s1726_s10  ;;  %p42_p13 = scmp.ne.s32.totalorder %s1603_s23, %s1599_s22 }
  0x1d   : > { %p33_p12 = scmp.eq.s32.totalorder %s32_s11, 0  ;;  %p43_p0 = scmp.eq.s32.totalorder %s1607_s24, 0 }
  0x1e   : > { %p1739_p3 = por %p156_p2, %p42_p13  ;;  %p1328_p5 = scmp.lt.s32.totalorder %s1607_s24, 2 }
  0x1f   : > { %s1735_s13 = scalar_select %p33_p12, %s1603_s23, %s35_s12  }
  0x20   : > { %s251_s16 = sand.u32 1, %s1603_s23   ;;  %s1252_s19 = sshll.u32 %s1607_s24, 4 }
  0x21   : > { %p44_p7 = por %p43_p0, %p42_p13  ;;  %s1097_s14 = sshll.u32 %s251_s16, 4 }
  0x22   : > { %s1946_s0 = sld [smem:[#allocation18_spill]]  ;;  %s255_s7 = scalar_lea.vmem [#allocation2], %s1097_s14 }
  0x23   : > { %s263_s9 = sshll.u32 %s255_s7, 4  ;;  %p1749_p10 = pnand %p1328_p5, %p44_p7  ;;  %s264_s9 = int_to_ptr.vmem [resolvable:$true] %s263_s9 }
  0x24   : > { %s252_s12 = scalar_lea.sflag [#allocation3], %s251_s16 }
  0x25   : > { %p1475_p11 = pneg %p1749_p10 }
  0x28   : > { %s260_s29 = scalar_lea.hbm %s1946_s0, %s1252_s19  ;;  %s1478_s14 = scalar_lea.hbm %s1946_s0, 32 }
  0x29   : > { %s261_s30 = sshll.u32 %s260_s29, 4  ;;  %s262_s30 = int_to_ptr.hbm [resolvable:$true] %s261_s30 }
  0x2a   : > { %s1471_s17 = sshra.s32 %s262_s30, 4  ;;  %s1472_s17 = int_to_ptr.hbm [resolvable:$true] %s1471_s17 }
  0x2b   : > { %s1473_s18 = scalar_lea.hbm %s1472_s17, 16  ;;  %p1479_p0 = scmp.lt.s32.totalorder %s1472_s17, %s1946_s0 }
  0x2c   : > { %p1474_p2 = scmp.ne.s32.totalorder %s1472_s17, %s1473_s18  ;;  %p1480_p5 = scmp.lt.s32.totalorder %s1478_s14, %s1473_s18 }
  0x2e   : > { %p1476_p12 = pnand %p1475_p11, %p1474_p2  ;;  %p1481_p7 = por %p1480_p5, %p1479_p0 }
  0x30   : > { %p1477_p13 = pneg %p1476_p12 }
  0x32   : > { %p1482_p9 = pnand %p1481_p7, %p1477_p13 }
  0x34   : > { %1485 = shalt.err (!%p1482_p9)
}
  0x35   : > { %s1948_s16 = smov 8   ;;  %s1949_s7 = smov 128  }
  0x36   : > { %1317 = dma.hbm_to_vmem [thread:$0]  (!%p1749_p10), %s262_s30, 256, %s264_s9, %s252_s12, %s1949_s7, %s1949_s7, %s1948_s16  }
  0x37   : > { %275 = sbr.rel (%p1697_p8) target bundleno = 1990 (0x7c6), region = 40  ;;  %s1769_s19 = sand.u32 (!%p1697_p8), 1, %s1599_s22  }
  0x38   : > { %s1939_s17 = sshll.u32 (!%p1697_p8), %s1769_s19, 4  ;;  %s278_s18 = scalar_lea.sflag (!%p1697_p8), [#allocation3], %s1769_s19 }
  0x39   : > { %s1775_s20 = scalar_lea.vmem (!%p1697_p8), [#allocation2], %s1939_s17 }
  0x3c   : > { %1574 = dma.done.wait (%p1684_p4), %s278_s18, 256  }
  0x3d   : > { %1576 = vsyncadd (%p1684_p4), %s278_s18, 4294967040 }
  0x3e   : > { %1578 = dma.done.wait (%p49_p1), [#allocation6], 2064  }
  0x3f   : > { %1580 = vsyncadd (%p49_p1), [#allocation6], 4294965232 }
  0x40   : > { %1582 = dma.done.wait (%p49_p1), [#allocation9], 2048  }
  0x41   : > { %1584 = vsyncadd (%p49_p1), [#allocation9], 4294965248  ;;  %v1165_v0 = vld [vmem:[#allocation7 + $0x70] sm:$0xf]  ;;  %v1268_v1 = vld [vmem:[#allocation7 + $0x74] sm:$0xf0] }
  0x42   : > { %v1267_v2 = vld [vmem:[#allocation7 + $0x74] sm:$0xf]  ;;  %v1166_v3 = vor.u32 %v1268_v1, %v1165_v0  ;;  %v1167_v4 = vld [vmem:[#allocation7 + $0x78] sm:$0xf0]  ;;  %v1157_v5 = vld [vmem:[#allocation7 + $0x60] sm:$0xf]  ;;  %v474_v0 = vlaneseq }
  0x43   : > { %v1266_v6 = vld [vmem:[#allocation7 + $0x64] sm:$0xf0]  ;;  %v1170_v7 = vor.u32 %v1267_v2, %v1167_v4  ;;  %v1265_v8 = vld [vmem:[#allocation7 + $0x64] sm:$0xf]  ;;  %v1159_v9 = vld [vmem:[#allocation7 + $0x68] sm:$0xf0] }
  0x44   : > { %438 = vmatpush.bf16.msra.mxu0 %v1166_v3  ;;  %v1158_v10 = vor.u32 %v1266_v6, %v1157_v5  ;;  %v1162_v11 = vor.u32 %v1265_v8, %v1159_v9  ;;  %v1149_v12 = vld [vmem:[#allocation7 + $0x50] sm:$0xf]  ;;  %v1264_v13 = vld [vmem:[#allocation7 + $0x54] sm:$0xf0]  ;;  %v1263_v14 = vld [vmem:[#allocation7 + $0x54] sm:$0xf] }
  0x45   : > { %452 = vmatpush.bf16.msra.mxu1 %v1170_v7  ;;  %v1151_v15 = vld [vmem:[#allocation7 + $0x58] sm:$0xf0]  ;;  %v1150_v16 = vor.u32 %v1264_v13, %v1149_v12  ;;  %v1141_v18 = vld [vmem:[#allocation7 + $0x40] sm:$0xf]  ;;  %v1262_v19 = vld [vmem:[#allocation7 + $0x44] sm:$0xf0] }
  0x46   : > { %v1154_v17 = vor.u32 %v1263_v14, %v1151_v15  ;;  %v1261_v20 = vld [vmem:[#allocation7 + $0x44] sm:$0xf]  ;;  %v1143_v21 = vld [vmem:[#allocation7 + $0x48] sm:$0xf0]  ;;  %v1142_v22 = vor.u32 %v1262_v19, %v1141_v18  ;;  %v1133_v24 = vld [vmem:[#allocation7 + $0x30] sm:$0xf] }
  0x47   : > { %v1146_v23 = vor.u32 %v1261_v20, %v1143_v21  ;;  %v1260_v25 = vld [vmem:[#allocation7 + $0x34] sm:$0xf0]  ;;  %v1259_v26 = vld [vmem:[#allocation7 + $0x34] sm:$0xf]  ;;  %v1135_v27 = vld [vmem:[#allocation7 + $0x38] sm:$0xf0] }
  0x48   : > { %439 = vmatpush.bf16.msra.mxu0 %v1158_v10  ;;  %v1134_v28 = vor.u32 %v1260_v25, %v1133_v24  ;;  %v1138_v29 = vor.u32 %v1259_v26, %v1135_v27  ;;  %v1125_v30 = vld [vmem:[#allocation7 + $0x20] sm:$0xf]  ;;  %v1258_v31 = vld [vmem:[#allocation7 + $0x24] sm:$0xf0]  ;;  %v1257_v32 = vld [vmem:[#allocation7 + $0x24] sm:$0xf] }
  0x49   : > { %453 = vmatpush.bf16.msra.mxu1 %v1162_v11  ;;  %v1127_v33 = vld [vmem:[#allocation7 + $0x28] sm:$0xf0]  ;;  %v1126_v34 = vor.u32 %v1258_v31, %v1125_v30  ;;  %v1117_v36 = vld [vmem:[#allocation7 + $0x10] sm:$0xf]  ;;  %v1256_v37 = vld [vmem:[#allocation7 + $0x14] sm:$0xf0] }
  0x4a   : > { %v1130_v35 = vor.u32 %v1257_v32, %v1127_v33  ;;  %v1255_v38 = vld [vmem:[#allocation7 + $0x14] sm:$0xf]  ;;  %v1119_v39 = vld [vmem:[#allocation7 + $0x18] sm:$0xf0]  ;;  %v1118_v41 = vor.u32 %v1256_v37, %v1117_v36  ;;  %v1109_v45 = vld [vmem:[#allocation7] sm:$0xf] }
  0x4b   : > { %v1375_v40 = vld [vmem:[#allocation5] ss:$0 sm:$0xff]  ;;  %v334_v43 = vld [vmem:[%s1775_s20 + $0x8] sm:$0xff]  ;;  %v1122_v44 = vor.u32 %v1255_v38, %v1119_v39  ;;  %v1804_v1 = vand.u32 127, %v474_v0  ;;  %s1106_s27 = sshll.u32 %s1769_s19, 1  ;;  %s1249_s11 = sshll.u32 %s1675_s25, 1 }
  0x4c   : > { %440 = vmatpush.bf16.msra.mxu0 %v1150_v16  ;;  %v333_v42 = vld [vmem:[%s1775_s20] sm:$0xff]  ;;  %v1254_v46 = vld [vmem:[#allocation7 + $0x4] sm:$0xf0]  ;;  %v340_v50 = vsub.f32 %v334_v43, %v1375_v40  ;;  %s330_s8 = scalar_lea.vmem [#allocation11], %s1106_s27  ;;  %s954_s26 = scalar_lea.hbm %s1936_s6, %s1249_s11 }
  0x4d   : > { %454 = vmatpush.bf16.msra.mxu1 %v1154_v17  ;;  %v1253_v47 = vld [vmem:[#allocation7 + $0x4] sm:$0xf]  ;;  %v1111_v48 = vld [vmem:[#allocation7 + $0x8] sm:$0xf0]  ;;  %v339_v49 = vsub.f32 %v333_v42, %v1375_v40  ;;  %v1110_v51 = vor.u32 %v1254_v46, %v1109_v45  ;;  %v1807_v2 = vadd.s32 128, %v1804_v1  ;;  %s956_s29 = sshll.u32 %s330_s8, 4  ;;  %s957_s29 = int_to_ptr.vmem [resolvable:$true] %s956_s29 }
  0x4e   : > { %v1114_v52 = vor.u32 %v1253_v47, %v1111_v48  ;;  %s958_s16 = sshll.u32 %s954_s26, 4  ;;  %s927_s7 = scalar_lea.sflag [#allocation12], %s1769_s19  ;;  %s959_s16 = int_to_ptr.hbm [resolvable:$true] %s958_s16 }
  0x4f   : > { %v341_v53 = vpack.c.bf16 %v340_v50, %v339_v49  ;;  %s1515_s18 = sshra.s32 %s959_s16, 4  ;;  %s1521_s9 = scalar_lea.hbm %s1936_s6, 4  ;;  %s1516_s18 = int_to_ptr.hbm [resolvable:$true] %s1515_s18 }
  0x50   : > { %441 = vmatpush.bf16.msra.mxu0 %v1142_v22  ;;  %s1517_s20 = scalar_lea.hbm %s1516_s18, 2  ;;  %p1522_p9 = scmp.lt.s32.totalorder %s1516_s18, %s1936_s6 }
  0x51   : > { %455 = vmatpush.bf16.msra.mxu1 %v1146_v23  ;;  %p1518_p1 = scmp.ne.s32.totalorder %s1516_s18, %s1517_s20  ;;  %p1523_p10 = scmp.lt.s32.totalorder %s1521_s9, %s1517_s20 }
  0x53   : > { %p1519_p4 = pnand %p1518_p1, %p1739_p3  ;;  %p1524_p2 = por %p1523_p10, %p1522_p9 }
  0x54   : > { %442 = vmatpush.bf16.msra.mxu0 %v1134_v28 }
  0x55   : > { %456 = vmatpush.bf16.msra.mxu1 %v1138_v29  ;;  %p1520_p8 = pneg %p1519_p4 }
  0x57   : > { %p1525_p11 = pnand %p1524_p2, %p1520_p8 }
  0x58   : > { %443 = vmatpush.bf16.msra.mxu0 %v1126_v34 }
  0x59   : > { %457 = vmatpush.bf16.msra.mxu1 %v1130_v35 }
  0x5c   : > { %444 = vmatpush.bf16.msra.mxu0 %v1118_v41 }
  0x5d   : > { %458 = vmatpush.bf16.msra.mxu1 %v1122_v44 }
  0x60   : > { %445 = vmatpush.bf16.msra.mxu0 %v1110_v51 }
  0x61   : > { %459 = vmatpush.bf16.msra.mxu1 %v1114_v52 }
  0x63   : > { %446 = vmatmul.bf16.vlgmr.msra.gmra.mxu0 %v341_v53 }
  0x64   : > { %460 = vmatmul.bf16.vlgmr.msra.gmra.mxu1 %v341_v53 }
  0xe0   : > { %v447_v54 = vpop.f32.mrf.mxu0 }
  0xe1   : > { %v1791_v55 = vclamps-f32 %v447_v54, 3e+38  ;;  %v461_v56 = vpop.f32.mrf.mxu1 }
  0xe2   : > { %v1793_v57 = vclamps-f32 %v461_v56, 3e+38 }
  0xe4   : > { %v477_v58 = vmax.f32 %v1791_v55, %v1793_v57 }
  0xe6   : > { %478 = vmax.xlane.f32.xlu0 %v477_v58 }
  0xe8   : > { %v449_v59 = vpop.f32.mrf.mxu0 }
  0xe9   : > { %v1797_v60 = vclamps-f32 %v449_v59, 3e+38  ;;  %v463_v61 = vpop.f32.mrf.mxu1 }
  0xea   : > { %v1799_v62 = vclamps-f32 %v463_v61, 3e+38 }
  0xec   : > { %v480_v63 = vmax.f32 %v1797_v60, %v1799_v62 }
  0xee   : > { %481 = vmax.xlane.f32.xlu0 %v480_v63 }
 0x159   : > { %v479_v3 = vpop.xlane.xlu0 %478 }
 0x15a   : > { %vm483_vm0 = vcmp.eq.f32.partialorder %v1791_v55, %v479_v3  ;;  %vm484_vm1 = vcmp.eq.f32.partialorder %v1793_v57, %v479_v3 }
 0x15b   : > { %v487_v4 = vsel %vm483_vm0, %v1804_v1, 256  ;;  %v488_v5 = vsel %vm484_vm1, %v1807_v2, 256 }
 0x15c   : > { %vm491_vm2 = vcmp.lt.s32.totalorder %v487_v4, %v488_v5 }
 0x15d   : > { %v492_v6 = vsel %vm491_vm2, %v487_v4, %v488_v5 }
 0x15e   : > { %v494_v7 = vshra.s32 %v492_v6, 16  ;;  %v493_v15 = vand.u32 65535, %v492_v6 }
 0x160   : > { %v496_v8 = vcvt.s32.f32 %v494_v7  ;;  %v495_v17 = vcvt.s32.f32 %v493_v15 }
 0x161   : > { %v482_v9 = vpop.xlane.xlu0 %481 }
 0x162   : > { %vm485_vm3 = vcmp.eq.f32.partialorder %v1797_v60, %v482_v9  ;;  %vm486_vm4 = vcmp.eq.f32.partialorder %v1799_v62, %v482_v9  ;;  %497 = vmin.xlane.f32.xlu1 %v496_v8 }
 0x163   : > { %v489_v10 = vsel %vm485_vm3, %v1804_v1, 256  ;;  %v490_v11 = vsel %vm486_vm4, %v1807_v2, 256 }
 0x164   : > { %vm507_vm5 = vcmp.lt.s32.totalorder %v489_v10, %v490_v11 }
 0x165   : > { %v508_v12 = vsel %vm507_vm5, %v489_v10, %v490_v11 }
 0x166   : > { %v510_v13 = vshra.s32 %v508_v12, 16  ;;  %v509_v19 = vand.u32 65535, %v508_v12 }
 0x168   : > { %v512_v14 = vcvt.s32.f32 %v510_v13  ;;  %v511_v21 = vcvt.s32.f32 %v509_v19 }
 0x16a   : > { %513 = vmin.xlane.f32.xlu1 %v512_v14 }
 0x1d5   : > { %v498_v16 = vpop.xlane.xlu1 %497 }
 0x1d6   : > { %vm499_vm6 = vcmp.eq.f32.partialorder %v496_v8, %v498_v16  ;;  %v504_v23 = vcvt.f32.s32 %v498_v16 }
 0x1d7   : > { %v500_v18 = vsel %vm499_vm6, %v495_v17, inf }
 0x1d8   : > { %501 = vmin.xlane.f32.xlu2 %v500_v18  ;;  %v505_v25 = vshll.u32 %v504_v23, 16 }
 0x1dd   : > { %v514_v20 = vpop.xlane.xlu1 %513 }
 0x1de   : > { %vm515_vm7 = vcmp.eq.f32.partialorder %v512_v14, %v514_v20  ;;  %v520_v28 = vcvt.f32.s32 %v514_v20 }
 0x1df   : > { %v516_v22 = vsel %vm515_vm7, %v511_v21, inf }
 0x1e0   : > { %517 = vmin.xlane.f32.xlu2 %v516_v22  ;;  %v521_v33 = vshll.u32 %v520_v28, 16 }
 0x24b   : > { %v502_v24 = vpop.xlane.xlu2 %501 }
 0x24c   : > { %v503_v26 = vcvt.f32.s32 %v502_v24 }
 0x24e   : > { %v506_v27 = vadd.s32 %v505_v25, %v503_v26 }
 0x250   : > { %vm523_vm8 = vcmp.eq.s32.totalorder %v1804_v1, %v506_v27  ;;  %vm524_vm9 = vcmp.eq.s32.totalorder %v1807_v2, %v506_v27 }
 0x251   : > { %v527_v29 = vsel %vm523_vm8, -inf, %v1791_v55  ;;  %v528_v30 = vsel %vm524_vm9, -inf, %v1793_v57 }
 0x252   : > { %v531_v31 = vmax.f32 %v527_v29, %v528_v30 }
 0x253   : > { %v518_v32 = vpop.xlane.xlu2 %517 }
 0x254   : > { %v519_v34 = vcvt.f32.s32 %v518_v32  ;;  %532 = vmax.xlane.f32.xlu0 %v531_v31 }
 0x256   : > { %v522_v35 = vadd.s32 %v521_v33, %v519_v34 }
 0x258   : > { %vm525_vm10 = vcmp.eq.s32.totalorder %v1804_v1, %v522_v35  ;;  %vm526_vm11 = vcmp.eq.s32.totalorder %v1807_v2, %v522_v35 }
 0x259   : > { %v529_v36 = vsel %vm525_vm10, -inf, %v1797_v60  ;;  %v530_v37 = vsel %vm526_vm11, -inf, %v1799_v62 }
 0x25a   : > { %v534_v38 = vmax.f32 %v529_v36, %v530_v37 }
 0x25c   : > { %535 = vmax.xlane.f32.xlu1 %v534_v38 }
 0x2c7   : > { %v533_v39 = vpop.xlane.xlu0 %532 }
 0x2c8   : > { %vm537_vm12 = vcmp.eq.f32.partialorder %v527_v29, %v533_v39  ;;  %vm538_vm13 = vcmp.eq.f32.partialorder %v528_v30, %v533_v39 }
 0x2c9   : > { %v541_v40 = vsel %vm537_vm12, %v1804_v1, 256  ;;  %v542_v41 = vsel %vm538_vm13, %v1807_v2, 256 }
 0x2ca   : > { %vm545_vm14 = vcmp.lt.s32.totalorder %v541_v40, %v542_v41 }
 0x2cb   : > { %v546_v42 = vsel %vm545_vm14, %v541_v40, %v542_v41 }
 0x2cc   : > { %v548_v43 = vshra.s32 %v546_v42, 16  ;;  %v547_v51 = vand.u32 65535, %v546_v42 }
 0x2ce   : > { %v550_v44 = vcvt.s32.f32 %v548_v43  ;;  %v549_v53 = vcvt.s32.f32 %v547_v51 }
 0x2cf   : > { %v536_v45 = vpop.xlane.xlu1 %535 }
 0x2d0   : > { %vm539_vm15 = vcmp.eq.f32.partialorder %v529_v36, %v536_v45  ;;  %vm540_vm0 = vcmp.eq.f32.partialorder %v530_v37, %v536_v45  ;;  %551 = vmin.xlane.f32.xlu2 %v550_v44 }
 0x2d1   : > { %v543_v46 = vsel %vm539_vm15, %v1804_v1, 256  ;;  %v544_v47 = vsel %vm540_vm0, %v1807_v2, 256 }
 0x2d2   : > { %vm561_vm1 = vcmp.lt.s32.totalorder %v543_v46, %v544_v47 }
 0x2d3   : > { %v562_v48 = vsel %vm561_vm1, %v543_v46, %v544_v47 }
 0x2d4   : > { %v564_v49 = vshra.s32 %v562_v48, 16  ;;  %v563_v56 = vand.u32 65535, %v562_v48 }
 0x2d6   : > { %v566_v50 = vcvt.s32.f32 %v564_v49  ;;  %v565_v59 = vcvt.s32.f32 %v563_v56 }
 0x2d8   : > { %567 = vmin.xlane.f32.xlu0 %v566_v50 }
 0x343   : > { %v552_v52 = vpop.xlane.xlu2 %551 }
 0x344   : > { %vm553_vm2 = vcmp.eq.f32.partialorder %v550_v44, %v552_v52  ;;  %v558_v63 = vcvt.f32.s32 %v552_v52 }
 0x345   : > { %v554_v54 = vsel %vm553_vm2, %v549_v53, inf }
 0x346   : > { %555 = vmin.xlane.f32.xlu1 %v554_v54  ;;  %v559_v4 = vshll.u32 %v558_v63, 16 }
 0x34b   : > { %v568_v58 = vpop.xlane.xlu0 %567 }
 0x34c   : > { %vm569_vm3 = vcmp.eq.f32.partialorder %v566_v50, %v568_v58  ;;  %v574_v7 = vcvt.f32.s32 %v568_v58 }
 0x34d   : > { %v570_v61 = vsel %vm569_vm3, %v565_v59, inf }
 0x34e   : > { %571 = vmin.xlane.f32.xlu2 %v570_v61  ;;  %v575_v12 = vshll.u32 %v574_v7, 16 }
 0x3b9   : > { %v556_v3 = vpop.xlane.xlu1 %555 }
 0x3ba   : > { %v557_v5 = vcvt.f32.s32 %v556_v3 }
 0x3bc   : > { %v560_v6 = vadd.s32 %v559_v4, %v557_v5 }
 0x3be   : > { %vm577_vm4 = vcmp.eq.s32.totalorder %v1804_v1, %v560_v6  ;;  %vm578_vm5 = vcmp.eq.s32.totalorder %v1807_v2, %v560_v6 }
 0x3bf   : > { %v581_v8 = vsel %vm577_vm4, -inf, %v527_v29  ;;  %v582_v9 = vsel %vm578_vm5, -inf, %v528_v30 }
 0x3c0   : > { %v585_v10 = vmax.f32 %v581_v8, %v582_v9 }
 0x3c1   : > { %v572_v11 = vpop.xlane.xlu2 %571 }
 0x3c2   : > { %v573_v13 = vcvt.f32.s32 %v572_v11  ;;  %586 = vmax.xlane.f32.xlu0 %v585_v10  ;;  %v1284_v10 = vld [vmem:[#allocation8 + $0x78] sm:$0xff]  ;;  %v1275_v11 = vld [vmem:[#allocation8 + $0x30] sm:$0xff] }
 0x3c3   : > { %875 = vmatpush.bf16.msra.mxu3 %v1284_v10 }
 0x3c4   : > { %v576_v14 = vadd.s32 %v575_v12, %v573_v13  ;;  %v1283_v12 = vld [vmem:[#allocation8 + $0x70] sm:$0xff]  ;;  %v1274_v13 = vld [vmem:[#allocation8 + $0x28] sm:$0xff] }
 0x3c6   : > { %vm579_vm6 = vcmp.eq.s32.totalorder %v1804_v1, %v576_v14  ;;  %vm580_vm7 = vcmp.eq.s32.totalorder %v1807_v2, %v576_v14  ;;  %v1282_v14 = vld [vmem:[#allocation8 + $0x68] sm:$0xff] }
 0x3c7   : > { %v583_v15 = vsel %vm579_vm6, -inf, %v529_v36  ;;  %v584_v16 = vsel %vm580_vm7, -inf, %v530_v37  ;;  %876 = vmatpush.bf16.msra.mxu3 %v1283_v12 }
 0x3c8   : > { %v588_v17 = vmax.f32 %v583_v15, %v584_v16 }
 0x3ca   : > { %589 = vmax.xlane.f32.xlu1 %v588_v17 }
 0x3cb   : > { %877 = vmatpush.bf16.msra.mxu3 %v1282_v14 }
 0x435   : > { %v587_v18 = vpop.xlane.xlu0 %586 }
 0x436   : > { %vm591_vm8 = vcmp.eq.f32.partialorder %v581_v8, %v587_v18  ;;  %vm592_vm9 = vcmp.eq.f32.partialorder %v582_v9, %v587_v18 }
 0x437   : > { %v595_v19 = vsel %vm591_vm8, %v1804_v1, 256  ;;  %v596_v20 = vsel %vm592_vm9, %v1807_v2, 256 }
 0x438   : > { %vm599_vm10 = vcmp.lt.s32.totalorder %v595_v19, %v596_v20 }
 0x439   : > { %v600_v21 = vsel %vm599_vm10, %v595_v19, %v596_v20 }
 0x43a   : > { %v602_v22 = vshra.s32 %v600_v21, 16  ;;  %v601_v30 = vand.u32 65535, %v600_v21 }
 0x43c   : > { %v604_v23 = vcvt.s32.f32 %v602_v22  ;;  %v603_v32 = vcvt.s32.f32 %v601_v30  ;;  %v1278_v30 = vld [vmem:[#allocation8 + $0x48] sm:$0xff] }
 0x43d   : > { %v590_v24 = vpop.xlane.xlu1 %589 }
 0x43e   : > { %vm593_vm11 = vcmp.eq.f32.partialorder %v583_v15, %v590_v24  ;;  %vm594_vm12 = vcmp.eq.f32.partialorder %v584_v16, %v590_v24  ;;  %605 = vmin.xlane.f32.xlu2 %v604_v23 }
 0x43f   : > { %v597_v25 = vsel %vm593_vm11, %v1804_v1, 256  ;;  %v598_v26 = vsel %vm594_vm12, %v1807_v2, 256 }
 0x440   : > { %vm615_vm13 = vcmp.lt.s32.totalorder %v597_v25, %v598_v26 }
 0x441   : > { %v616_v27 = vsel %vm615_vm13, %v597_v25, %v598_v26  ;;  %v1272_v25 = vld [vmem:[#allocation8 + $0x18] sm:$0xff] }
 0x442   : > { %v618_v28 = vshra.s32 %v616_v27, 16  ;;  %v617_v34 = vand.u32 65535, %v616_v27  ;;  %v1280_v26 = vld [vmem:[#allocation8 + $0x58] sm:$0xff]  ;;  %v1271_v27 = vld [vmem:[#allocation8 + $0x10] sm:$0xff] }
 0x444   : > { %v620_v29 = vcvt.s32.f32 %v618_v28  ;;  %v619_v36 = vcvt.s32.f32 %v617_v34  ;;  %v1279_v28 = vld [vmem:[#allocation8 + $0x50] sm:$0xff] }
 0x446   : > { %621 = vmin.xlane.f32.xlu0 %v620_v29 }
 0x4b1   : > { %v606_v31 = vpop.xlane.xlu2 %605 }
 0x4b2   : > { %vm607_vm14 = vcmp.eq.f32.partialorder %v604_v23, %v606_v31  ;;  %v612_v38 = vcvt.f32.s32 %v606_v31  ;;  %v1269_v31 = vld [vmem:[#allocation8] sm:$0xff] }
 0x4b3   : > { %v608_v33 = vsel %vm607_vm14, %v603_v32, inf  ;;  %v1277_v32 = vld [vmem:[#allocation8 + $0x40] sm:$0xff] }
 0x4b4   : > { %609 = vmin.xlane.f32.xlu1 %v608_v33  ;;  %v613_v40 = vshll.u32 %v612_v38, 16 }
 0x4b9   : > { %v622_v35 = vpop.xlane.xlu0 %621 }
 0x4ba   : > { %vm623_vm15 = vcmp.eq.f32.partialorder %v620_v29, %v622_v35  ;;  %v628_v43 = vcvt.f32.s32 %v622_v35  ;;  %v1270_v29 = vld [vmem:[#allocation8 + $0x8] sm:$0xff] }
 0x4bb   : > { %v624_v37 = vsel %vm623_vm15, %v619_v36, inf }
 0x4bc   : > { %625 = vmin.xlane.f32.xlu2 %v624_v37  ;;  %v629_v48 = vshll.u32 %v628_v43, 16 }
 0x527   : > { %v610_v39 = vpop.xlane.xlu1 %609 }
 0x528   : > { %v611_v41 = vcvt.f32.s32 %v610_v39 }
 0x52a   : > { %v614_v42 = vadd.s32 %v613_v40, %v611_v41 }
 0x52c   : > { %vm631_vm0 = vcmp.eq.s32.totalorder %v1804_v1, %v614_v42  ;;  %vm632_vm1 = vcmp.eq.s32.totalorder %v1807_v2, %v614_v42 }
 0x52d   : > { %v1839_v44 = vsel %vm631_vm0, -inf, %v581_v8  ;;  %v1841_v45 = vsel %vm632_vm1, -inf, %v582_v9  ;;  %v1276_v9 = vld [vmem:[#allocation8 + $0x38] sm:$0xff] }
 0x52e   : > { %v639_v46 = vmax.f32 %v1839_v44, %v1841_v45  ;;  %861 = vmatpush.bf16.msra.mxu2 %v1276_v9 }
 0x52f   : > { %v626_v47 = vpop.xlane.xlu2 %625 }
 0x530   : > { %v627_v49 = vcvt.f32.s32 %v626_v47  ;;  %640 = vmax.xlane.f32.xlu0 %v639_v46 }
 0x532   : > { %v630_v50 = vadd.s32 %v629_v48, %v627_v49  ;;  %862 = vmatpush.bf16.msra.mxu2 %v1275_v11  ;;  %v1240_v49 = vpack.c.bf16 %v1797_v60, %v1791_v55 }
 0x534   : > { %vm633_vm2 = vcmp.eq.s32.totalorder %v1804_v1, %v630_v50  ;;  %vm634_vm3 = vcmp.eq.s32.totalorder %v1807_v2, %v630_v50 }
 0x535   : > { %v1847_v51 = vsel %vm633_vm2, -inf, %v583_v15  ;;  %v1849_v52 = vsel %vm634_vm3, -inf, %v584_v16  ;;  %v1273_v15 = vld [vmem:[#allocation8 + $0x20] sm:$0xff] }
 0x536   : > { %v642_v53 = vmax.f32 %v1847_v51, %v1849_v52  ;;  %863 = vmatpush.bf16.msra.mxu2 %v1274_v13  ;;  %v1281_v16 = vld [vmem:[#allocation8 + $0x60] sm:$0xff] }
 0x537   : > { %878 = vmatpush.bf16.msra.mxu3 %v1281_v16 }
 0x538   : > { %643 = vmax.xlane.f32.xlu1 %v642_v53 }
 0x53a   : > { %864 = vmatpush.bf16.msra.mxu2 %v1273_v15 }
 0x53b   : > { %879 = vmatpush.bf16.msra.mxu3 %v1280_v26 }
 0x53e   : > { %865 = vmatpush.bf16.msra.mxu2 %v1272_v25 }
 0x53f   : > { %880 = vmatpush.bf16.msra.mxu3 %v1279_v28 }
 0x542   : > { %866 = vmatpush.bf16.msra.mxu2 %v1271_v27 }
 0x543   : > { %881 = vmatpush.bf16.msra.mxu3 %v1278_v30 }
 0x546   : > { %867 = vmatpush.bf16.msra.mxu2 %v1270_v29 }
 0x547   : > { %882 = vmatpush.bf16.msra.mxu3 %v1277_v32 }
 0x54a   : > { %868 = vmatpush.bf16.msra.mxu2 %v1269_v31 }
 0x5a3   : > { %v641_v54 = vpop.xlane.xlu0 %640 }
 0x5a4   : > { %vm645_vm4 = vcmp.eq.f32.partialorder %v1839_v44, %v641_v54  ;;  %vm646_vm5 = vcmp.eq.f32.partialorder %v1841_v45, %v641_v54 }
 0x5a5   : > { %v649_v56 = vsel %vm645_vm4, %v1804_v1, 256  ;;  %v650_v58 = vsel %vm646_vm5, %v1807_v2, 256 }
 0x5a6   : > { %vm653_vm6 = vcmp.lt.s32.totalorder %v649_v56, %v650_v58 }
 0x5a7   : > { %v654_v59 = vsel %vm653_vm6, %v649_v56, %v650_v58  ;;  %vm716_vm6 = vcmask 1040384  }
 0x5a8   : > { %v656_v61 = vshra.s32 %v654_v59, 16  ;;  %v655_v17 = vand.u32 65535, %v654_v59 }
 0x5aa   : > { %v658_v63 = vcvt.s32.f32 %v656_v61  ;;  %v657_v19 = vcvt.s32.f32 %v655_v17 }
 0x5ab   : > { %v644_v3 = vpop.xlane.xlu1 %643 }
 0x5ac   : > { %vm647_vm7 = vcmp.eq.f32.partialorder %v1847_v51, %v644_v3  ;;  %vm648_vm8 = vcmp.eq.f32.partialorder %v1849_v52, %v644_v3  ;;  %659 = vmin.xlane.f32.xlu2 %v658_v63 }
 0x5ad   : > { %v651_v4 = vsel %vm647_vm7, %v1804_v1, 256  ;;  %v652_v5 = vsel %vm648_vm8, %v1807_v2, 256  ;;  %vm720_vm7 = vcmp.lt.s32.totalorder %v474_v0, 256 }
 0x5ae   : > { %vm669_vm9 = vcmp.lt.s32.totalorder %v651_v4, %v652_v5 }
 0x5af   : > { %v670_v6 = vsel %vm669_vm9, %v651_v4, %v652_v5 }
 0x5b0   : > { %v672_v7 = vshra.s32 %v670_v6, 16  ;;  %v671_v21 = vand.u32 65535, %v670_v6 }
 0x5b2   : > { %v674_v8 = vcvt.s32.f32 %v672_v7  ;;  %v673_v23 = vcvt.s32.f32 %v671_v21  ;;  %v1376_v7 = vld [vmem:[%s1934_s4] ss:$0 sm:$0xff] }
 0x5b4   : > { %675 = vmin.xlane.f32.xlu0 %v674_v8 }
 0x61f   : > { %v660_v18 = vpop.xlane.xlu2 %659 }
 0x620   : > { %vm661_vm10 = vcmp.eq.f32.partialorder %v658_v63, %v660_v18  ;;  %v666_v33 = vcvt.f32.s32 %v660_v18 }
 0x621   : > { %v662_v20 = vsel %vm661_vm10, %v657_v19, inf }
 0x622   : > { %663 = vmin.xlane.f32.xlu1 %v662_v20  ;;  %v667_v35 = vshll.u32 %v666_v33, 16 }
 0x627   : > { %v676_v22 = vpop.xlane.xlu0 %675 }
 0x628   : > { %vm677_vm11 = vcmp.eq.f32.partialorder %v674_v8, %v676_v22  ;;  %v682_v38 = vcvt.f32.s32 %v676_v22 }
 0x629   : > { %v678_v24 = vsel %vm677_vm11, %v673_v23, inf }
 0x62a   : > { %679 = vmin.xlane.f32.xlu2 %v678_v24  ;;  %v683_v40 = vshll.u32 %v682_v38, 16 }
 0x695   : > { %v664_v34 = vpop.xlane.xlu1 %663 }
 0x696   : > { %v665_v36 = vcvt.f32.s32 %v664_v34 }
 0x698   : > { %v668_v37 = vadd.s32 %v667_v35, %v665_v36 }
 0x69a   : > { %vm685_vm12 = vcmp.eq.s32.totalorder %v1804_v1, %v668_v37  ;;  %vm686_vm13 = vcmp.eq.s32.totalorder %v1807_v2, %v668_v37 }
 0x69b   : > { %v689_v42 = vsel %vm685_vm12, -inf, %v1839_v44  ;;  %v690_v43 = vsel %vm686_vm13, -inf, %v1841_v45  ;;  %v1243_v44 = vpack.c.bf16 %v1799_v62, %v1793_v57  ;;  %v1616_v45 = vmov 0  }
 0x69c   : > { %vm693_vm0 = vcmp.eq.f32.partialorder %v689_v42, -inf  ;;  %vm694_vm1 = vcmp.eq.f32.partialorder %v690_v43, -inf }
 0x69d   : > { %v680_v39 = vpop.xlane.xlu2 %679  ;;  %v697_v50 = vsel %vm693_vm0, 1, %v1616_v45 }
 0x69e   : > { %v681_v41 = vcvt.f32.s32 %v680_v39 }
 0x6a0   : > { %v684_v46 = vadd.s32 %v683_v40, %v681_v41 }
 0x6a2   : > { %vm687_vm14 = vcmp.eq.s32.totalorder %v1804_v1, %v684_v46  ;;  %vm688_vm15 = vcmp.eq.s32.totalorder %v1807_v2, %v684_v46  ;;  %v698_v1 = vsel %vm694_vm1, 1, %v1616_v45 }
 0x6a3   : > { %v691_v47 = vsel %vm687_vm14, -inf, %v1847_v51  ;;  %v692_v48 = vsel %vm688_vm15, -inf, %v1849_v52 }
 0x6a4   : > { %vm695_vm2 = vcmp.eq.f32.partialorder %v691_v47, -inf  ;;  %vm696_vm3 = vcmp.eq.f32.partialorder %v692_v48, -inf }
 0x6a5   : > { %v699_v53 = vsel %vm695_vm2, 1, %v1616_v45  ;;  %vm1239_vm4 = vmpackc.low %vm695_vm2, %vm693_vm0  ;;  %v700_v2 = vsel %vm696_vm3, 1, %v1616_v45 }
 0x6a6   : > { %v701_v54 = vadd.s32 %v699_v53, %v697_v50  ;;  %1241 = vmatmul.msk.bf16.vlgmr.msra.gmra.mxu2 %vm1239_vm4, %v1240_v49  ;;  %v708_v51 = vadd.s32 %v700_v2, %v698_v1  ;;  %vm1242_vm5 = vmpackc.low %vm696_vm3, %vm694_vm1 }
 0x6a7   : > { %1244 = vmatmul.msk.bf16.vlgmr.msra.gmra.mxu3 %vm1242_vm5, %v1243_v44 }
 0x6a8   : > { %v702_v52 = vrot.slane %v701_v54, 4  ;;  %v709_v55 = vrot.slane %v708_v51, 4 }
 0x6aa   : > { %v703_v60 = vadd.s32 %v702_v52, %v701_v54  ;;  %v710_v56 = vadd.s32 %v709_v55, %v708_v51 }
 0x6ac   : > { %v704_v58 = vrot.slane %v703_v60, 2  ;;  %v711_v57 = vrot.slane %v710_v56, 2 }
 0x6ae   : > { %v705_v62 = vadd.s32 %v704_v58, %v703_v60  ;;  %v712_v59 = vadd.s32 %v711_v57, %v710_v56 }
 0x6b0   : > { %v706_v61 = vrot.slane %v705_v62, 1  ;;  %v713_v63 = vrot.slane %v712_v59, 1 }
 0x6b2   : > { %v714_v3 = vadd.s32 %v713_v63, %v712_v59  ;;  %v707_v4 = vadd.s32 %v706_v61, %v705_v62 }
 0x6b4   : > { %v715_v5 = vrot.slane %v714_v3, 7 }
 0x6b6   : > { %v717_v6 = vsel %vm716_vm6, %v707_v4, %v715_v5 }
 0x6b7   : > { %722 = vst.msk [vmem:[%s330_s8] sm:$0x3] %vm720_vm7, %v717_v6 }
 0x729   : > { %v870_v8 = vpop.f32.mrf.mxu2 }
 0x72a   : > { %v871_v9 = vadd.f32 %v1376_v7, %v870_v8  ;;  %v884_v10 = vpop.f32.mrf.mxu3 }
 0x72c   : > { %v885_v11 = vadd.f32 %v884_v10, %v871_v9 }
 0x72e   : > { %v889_v12 = vmul.f32 %v885_v11, %v885_v11 }
 0x730   : > { %891 = vadd.xlane.f32.xlu0 %v889_v12 }
 0x731   : > { %v872_v13 = vpop.f32.mrf.mxu2 }
 0x732   : > { %v873_v14 = vadd.f32 %v1376_v7, %v872_v13  ;;  %v886_v15 = vpop.f32.mrf.mxu3 }
 0x734   : > { %v887_v0 = vadd.f32 %v886_v15, %v873_v14 }
 0x736   : > { %v890_v16 = vmul.f32 %v887_v0, %v887_v0 }
 0x738   : > { %893 = vadd.xlane.f32.xlu1 %v890_v16 }
 0x739   : > { %1528 = shalt.err (!%p1525_p11)
}
 0x73a   : > { %1301 = dma.vmem_to_hbm [thread:$0]  (%p1739_p3), %s957_s29, 32, %s959_s16, %s927_s7  }
 0x73b   : > { %s1285_s0 = sshll.u32 %s1675_s25, 4  ;;  %s1950_s12 = sshll.u32 %s1769_s19, 4 }
 0x73c   : > { %s938_s11 = scalar_lea.hbm %s1935_s5, %s1285_s0  ;;  %s323_s14 = scalar_lea.vmem [#allocation10], %s1950_s12 }
 0x73d   : > { %s939_s26 = sshll.u32 %s323_s14, 4  ;;  %s941_s29 = sshll.u32 %s938_s11, 4  ;;  %s940_s26 = int_to_ptr.vmem [resolvable:$true] %s939_s26  ;;  %s942_s29 = int_to_ptr.hbm [resolvable:$true] %s941_s29 }
 0x73e   : > { %s922_s25 = scalar_lea.sflag [#allocation4], %s1769_s19  ;;  %s1543_s16 = sshra.s32 %s942_s29, 4  ;;  %s1544_s16 = int_to_ptr.hbm [resolvable:$true] %s1543_s16 }
 0x73f   : > { %s1545_s7 = scalar_lea.hbm %s1544_s16, 16  ;;  %s1549_s27 = scalar_lea.hbm %s1935_s5, 32 }
 0x740   : > { %p1546_p12 = scmp.ne.s32.totalorder %s1544_s16, %s1545_s7  ;;  %p1550_p5 = scmp.lt.s32.totalorder %s1544_s16, %s1935_s5 }
 0x741   : > { %p1551_p7 = scmp.lt.s32.totalorder %s1549_s27, %s1545_s7 }
 0x742   : > { %p1547_p13 = pnand %p1546_p12, %p1739_p3 }
 0x743   : > { %p1552_p1 = por %p1551_p7, %p1550_p5 }
 0x744   : > { %p1548_p0 = pneg %p1547_p13 }
 0x746   : > { %p1553_p4 = pnand %p1552_p1, %p1548_p0 }
 0x7a3   : > { %v892_v17 = vpop.xlane.xlu0 %891 }
 0x7a4   : > { %v895_v18 = vmax.f32 %v892_v17, 1e-24 }
 0x7a6   : > { %1377 = vrsqrt.f32 %v895_v18  ;;  %vm903_vm9 = vweird.f32 %v895_v18 }
 0x7ab   : > { %v894_v19 = vpop.xlane.xlu1 %893 }
 0x7ac   : > { %v1378_v20 = vpop.eup %1377  ;;  %v896_v21 = vmax.f32 %v894_v19, 1e-24 }
 0x7ad   : > { %v898_v22 = vmul.f32 %v1378_v20, %v895_v18  ;;  %vm904_vm8 = vweird.f32 %v1378_v20 }
 0x7ae   : > { %1379 = vrsqrt.f32 %v896_v21  ;;  %vm905_vm10 = vmor %vm903_vm9, %vm904_vm8  ;;  %vm913_vm12 = vweird.f32 %v896_v21 }
 0x7af   : > { %v899_v23 = vmul.f32 %v1378_v20, %v898_v22 }
 0x7b1   : > { %v900_v24 = vmul.f32 0.5, %v899_v23 }
 0x7b3   : > { %v901_v25 = vsub.f32 1.5, %v900_v24 }
 0x7b4   : > { %v1380_v26 = vpop.eup %1379 }
 0x7b5   : > { %v902_v27 = vmul.f32 %v1378_v20, %v901_v25  ;;  %v908_v28 = vmul.f32 %v1380_v26, %v896_v21  ;;  %vm914_vm11 = vweird.f32 %v1380_v26 }
 0x7b6   : > { %vm915_vm13 = vmor %vm913_vm12, %vm914_vm11 }
 0x7b7   : > { %v906_v29 = vsel %vm905_vm10, %v1378_v20, %v902_v27  ;;  %v909_v30 = vmul.f32 %v1380_v26, %v908_v28 }
 0x7b8   : > { %v917_v31 = vmul.f32 %v906_v29, %v885_v11 }
 0x7b9   : > { %v910_v32 = vmul.f32 0.5, %v909_v30 }
 0x7ba   : > { %919 = vst [vmem:[%s323_s14] sm:$0xff] %v917_v31 }
 0x7bb   : > { %v911_v33 = vsub.f32 1.5, %v910_v32 }
 0x7bd   : > { %v912_v34 = vmul.f32 %v1380_v26, %v911_v33 }
 0x7bf   : > { %v916_v35 = vsel %vm915_vm13, %v1380_v26, %v912_v34 }
 0x7c0   : > { %v918_v36 = vmul.f32 %v916_v35, %v887_v0 }
 0x7c2   : > { %920 = vst [vmem:[%s323_s14 + $0x8] sm:$0xff] %v918_v36 }
 0x7c3   : > { %1556 = shalt.err (!%p1553_p4)
}
 0x7c4   : > { %s1617_s19 = smov 128   ;;  %s1618_s0 = smov 8  }
 0x7c5   : > { %1300 = dma.vmem_to_hbm [thread:$0]  (%p1739_p3), %s940_s26, 256, %s942_s29, %s922_s25, %s1617_s19, %s1617_s19, %s1618_s0  }
 0x7c6 PF: > { %s970_s17 = sand.u32 1, %s1595_s21   ;;  %p1951_p8 = scmp.ge.s32.totalorder %s1607_s24, 2 }
 0x7c7   : > { %s971_s8 = scalar_lea.sflag [#allocation4], %s970_s17 }
 0x7c8   : > { %p1319_p9 = pnand %p1951_p8, %p1689_p6 }
 0x7ca   : > { %p1320_p10 = pneg %p1319_p9 }
 0x7cc   : > { %1586 = dma.done.wait (%p1320_p10), %s971_s8, 256  }
 0x7cd   : > { %1588 = vsyncadd (%p1320_p10), %s971_s8, 4294967040  ;;  %s981_s11 = scalar_lea.sflag [#allocation12], %s970_s17 }
 0x7ce   : > { %1590 = dma.done.wait (%p1320_p10), %s981_s11, 32  }
 0x7cf   : > { %1592 = vsyncadd (%p1320_p10), %s981_s11, 4294967264  ;;  %p25_p3 = scmp.ge.s32.totalorder %s1726_s10, 4   ;;  %s1952_s21 = smov %s1599_s22 }
 0x7d0   : > { %s1953_s22 = smov %s1603_s23  ;;  %s1954_s23 = smov %s1735_s13 }
 0x7d1   : > { %s1955_s24 = smov %s1726_s10  ;;  %27 = sbr.rel (!%p25_p3) target bundleno = 11 (0xb), region = 114 }
 0x7d6   :  { %987 = vsyncpa [#allocation3], 1 }
 0x7d7   :  { %989 = vsyncpa [#allocation3 + $0x1], 1 }
 0x7d8   :  { %990 = vsyncpa [#allocation6], 1 }
 0x7d9   :  { %991 = vsyncpa [#allocation9], 1 }
 0x7da   :  { %992 = vsyncpa [#allocation4], 1 }
 0x7db   :  { %994 = vsyncpa [#allocation4 + $0x1], 1 }
 0x7dc   :  { %995 = vsyncpa [#allocation12], 1 }
 0x7dd   :  { %997 = vsyncpa [#allocation12 + $0x1], 1 }

</bundles_post_ra>
